<compile_context>
chip_gen: v5e
topology: v5e:2x2
jax: 0.10.0
libtpu: 0.0.40
codegen_flags: <defaults>
</compile_context>

<pallas_src>
import functools

import jax
import jax.numpy as jnp
import numpy as np
from jax import lax
from jax.experimental import pallas as pl
from jax.experimental.pallas import tpu as pltpu


# ----------------------------------------------------------------------------
# Tap bookkeeping: k = 3*(dy+1) + (dx+1), shift s = dy*W + dx along flat HW.
# ----------------------------------------------------------------------------
def _tap_shifts(W, N):
    """Roll amounts so that roll(v, shift, axis=-1)[..., p] == v[..., p + dy*W + dx]."""
    out = []
    for dy in (-1, 0, 1):
        for dx in (-1, 0, 1):
            out.append((-(dy * W + dx)) % N)
    return out


def _make_tap_masks(H, W):
    """(9, HW) 0/1 masks: tap k valid where 0 <= y+dy < H and 0 <= x+dx < W."""
    m = np.zeros((9, H, W), np.float32)
    k = 0
    for dy in (-1, 0, 1):
        for dx in (-1, 0, 1):
            ys = slice(max(0, -dy), min(H, H - dy))
            xs = slice(max(0, -dx), min(W, W - dx))
            m[k, ys, xs] = 1.0
            k += 1
    return m.reshape(9, H * W)


def _masked_roll_stack(v, masks_ref, shifts, hw):
    """9-tap shifted+masked copies of v (C, N), concatenated along sublanes
    -> (9*C, N).  Rolls hit the XLU; mask multiplies hit the VPU."""
    taps = []
    for k in range(9):
        s = shifts[k]
        r = pltpu.roll(v, shift=s, axis=1) if s else v
        if k == 4:                      # center tap: shift 0, mask all-ones
            taps.append(r)
        else:
            taps.append(r * masks_ref[k:k + 1, 0:hw])
    return jnp.concatenate(taps, axis=0)


# ----------------------------------------------------------------------------
# Fused kernel: prologue (all x-only work) + serial recurrence.
# ----------------------------------------------------------------------------
def _bottleneck_lstm_kernel(x_ref, h0_ref, c0_ref, masks_ref, wfx_ref, btot_ref,
                            wyh_ref, wf_ref, h_out_ref, c_out_ref, xproj_ref,
                            *, H, W, T, Chid):
    HW = H * W
    N = T * HW
    shifts_hw = _tap_shifts(W, HW)     # recurrence rolls (per image)
    shifts_thw = _tap_shifts(W, N)     # prologue rolls (all T images at once;
                                       # cross-image wrap positions are masked)

    # --- Prologue: xproj[t] = (dwconv3x3(x[t];W)+b_W) @ Wy_x + b_y, batched ---
    x = x_ref[...]                                              # (Cin, T*HW)
    stacked_x = _masked_roll_stack(x, masks_ref, shifts_thw, N)  # (9*Cin, T*HW)
    xproj_all = (jnp.dot(wfx_ref[...], stacked_x,
                         preferred_element_type=jnp.float32)
                 + btot_ref[...])                               # (Chid, T*HW)
    for t in range(T):                                          # static, aligned lane slices
        xproj_ref[t] = xproj_all[:, t * HW:(t + 1) * HW]

    # --- Serial recurrence: h/c carried as values, one MXU push per step ------
    wyh = wyh_ref[...]                 # (Chid, Chid)   hidden half of Wy (out, in)
    wf = wf_ref[...]                   # (4*Chid, 9*Chid) dwconv folded into gates

    def step(t, carry):
        h, c = carry                                            # (Chid, HW) each
        i2 = xproj_ref[t] + jnp.dot(wyh, h, preferred_element_type=jnp.float32)
        stacked = _masked_roll_stack(i2, masks_ref, shifts_hw, HW)  # (9*Chid, HW)
        g = jnp.dot(wf, stacked, preferred_element_type=jnp.float32)  # (4*Chid, HW)
        # Gate order [i, f, o, c]: one contiguous sigmoid + one clip.
        sig = jax.nn.sigmoid(g[0:3 * Chid, :])
        ci = sig[0 * Chid:1 * Chid, :]
        cf = sig[1 * Chid:2 * Chid, :]
        co = sig[2 * Chid:3 * Chid, :]
        bc = jnp.clip(g[3 * Chid:4 * Chid, :], 0.0, 6.0)        # ReLU6
        cc = cf * c + ci * bc
        ch = co * jnp.clip(cc, 0.0, 6.0)
        h_out_ref[t] = ch
        c_out_ref[t] = cc
        return ch, cc

    lax.fori_loop(0, T, step, (h0_ref[...], c0_ref[...]), unroll=True)


# ----------------------------------------------------------------------------
# Wrapper: layout prep + weight fusion + single pallas_call.
# ----------------------------------------------------------------------------
def bottleneck_lstm(x, h0, c0, params):
    T, Cin, H, W = x.shape
    Chid = h0.shape[0]
    HW = H * W

    # Channels-first, spatially flattened (pixel axis -> 128-wide lanes).
    x_cf = jnp.transpose(x.reshape(T, Cin, HW), (1, 0, 2)).reshape(Cin, T * HW)
    h02 = h0.reshape(Chid, HW)
    c02 = c0.reshape(Chid, HW)

    # Border masks, tiled across the T images for the batched prologue rolls.
    masks = jnp.asarray(np.tile(_make_tap_masks(H, W), (1, T)))   # (9, T*HW)

    # Fused weights.
    w9_in = params["w_dw_in"].reshape(9, Cin)                     # (3,3,Cin) -> (9,Cin)
    w9_hid = params["w_dw_hid"].reshape(9, Chid)
    # wfx[j, k*Cin + c] = wy_x[j, c] * w9_in[k, c]
    wfx = jnp.transpose(w9_in[:, None, :] * params["wy_x"][None, :, :],
                        (1, 0, 2)).reshape(Chid, 9 * Cin)
    # Total input bias folded through Wy:  wy_x @ b_dw_in + b_y.
    b_tot = (params["wy_x"] @ params["b_dw_in"] + params["b_y"]).reshape(Chid, 1)
    # Gate weights in [i, f, o, c] order, (out, in) orientation.
    wgT = jnp.concatenate([params["w_bi"], params["w_bf"],
                           params["w_bo"], params["w_bc"]], axis=0)   # (4*Chid, Chid)
    # wf[j, k*Chid + c] = wgT[j, c] * w9_hid[k, c]   (Wi is bias-free)
    wf = jnp.transpose(w9_hid[:, None, :] * wgT[None, :, :],
                       (1, 0, 2)).reshape(4 * Chid, 9 * Chid)

    const = lambda shape: pl.BlockSpec(shape, lambda i: (0,) * len(shape))

    h_out, c_out = pl.pallas_call(
        functools.partial(_bottleneck_lstm_kernel, H=H, W=W, T=T, Chid=Chid),
        out_shape=(jax.ShapeDtypeStruct((T, Chid, HW), jnp.float32),
                   jax.ShapeDtypeStruct((T, Chid, HW), jnp.float32)),
        grid_spec=pltpu.PrefetchScalarGridSpec(
            num_scalar_prefetch=0,
            grid=(1,),
            in_specs=[
                const((Cin, T * HW)),        # x (channels-first, flattened)
                const((Chid, HW)),           # h0
                const((Chid, HW)),           # c0
                const((9, T * HW)),          # border masks
                const((Chid, 9 * Cin)),      # fused input-proj weights
                const((Chid, 1)),            # fused input-proj bias
                const((Chid, Chid)),         # Wy (hidden half)
                const((4 * Chid, 9 * Chid)), # dwconv-folded gate weights
            ],
            out_specs=[
                const((T, Chid, HW)),        # hidden states
                const((T, Chid, HW)),        # cell states
            ],
            scratch_shapes=[pltpu.VMEM((T, Chid, HW), jnp.float32)],  # xproj
        ),
        compiler_params=pltpu.CompilerParams(
            dimension_semantics=("arbitrary",)),
    )(x_cf, h02, c02, masks, wfx, b_tot, params["wy_h"], wf)

    return h_out.reshape(T, Chid, H, W), c_out.reshape(T, Chid, H, W)


# ----------------------------------------------------------------------------
# Pure-JAX reference (mirrors the PyTorch forward; NCHW in / NCHW out)
# ----------------------------------------------------------------------------
def bottleneck_lstm_ref(x, h0, c0, p):
    hp = lax.Precision.HIGHEST

    def dwconv(v, w):                   # v: (H, W, C), w: (3, 3, C)
        C = v.shape[-1]
        return lax.conv_general_dilated(
            v[None], w.reshape(3, 3, 1, C), (1, 1), "SAME",
            dimension_numbers=("NHWC", "HWIO", "NHWC"),
            feature_group_count=C, precision=hp)[0]

    def onebyone(v, w):                 # w: (out, in)
        return jnp.einsum("hwc,dc->hwd", v, w, precision=hp)

    xs = jnp.transpose(x, (0, 2, 3, 1))
    h = jnp.transpose(h0, (1, 2, 0))
    c = jnp.transpose(c0, (1, 2, 0))
    hs, cs = [], []
    for t in range(xs.shape[0]):
        xw = dwconv(xs[t], p["w_dw_in"]) + p["b_dw_in"]
        i = onebyone(xw, p["wy_x"]) + onebyone(h, p["wy_h"]) + p["b_y"]
        b = dwconv(i, p["w_dw_hid"])
        ci = jax.nn.sigmoid(onebyone(b, p["w_bi"]))
        cf = jax.nn.sigmoid(onebyone(b, p["w_bf"]))
        bc = jnp.clip(onebyone(b, p["w_bc"]), 0.0, 6.0)
        co = jax.nn.sigmoid(onebyone(b, p["w_bo"]))
        cc = cf * c + ci * bc
        ch = co * jnp.clip(cc, 0.0, 6.0)
        h, c = ch, cc
        hs.append(ch)
        cs.append(cc)
    h_all = jnp.transpose(jnp.stack(hs), (0, 3, 1, 2))
    c_all = jnp.transpose(jnp.stack(cs), (0, 3, 1, 2))
    return h_all, c_all


# ----------------------------------------------------------------------------
# Deterministic synthetic parameters + run
# ----------------------------------------------------------------------------
def make_params(key, cin, chid):
    ks = jax.random.split(key, 10)
    n = lambda k, s, scale=0.1: (scale * jax.random.normal(k, s)).astype(jnp.float32)
    return {
        # nn.Conv2d(Cin, Cin, 3, groups=Cin, padding=1): weight (Cin,1,3,3) -> (3,3,Cin)
        "w_dw_in": n(ks[0], (3, 3, cin)),
        "b_dw_in": n(ks[1], (cin,)),
        # nn.Conv2d(Cin+Chid, Chid, 1): weight split into x / h halves, (out, in)
        "wy_x": n(ks[2], (chid, cin)),
        "wy_h": n(ks[3], (chid, chid)),
        "b_y": n(ks[4], (chid,)),
        # nn.Conv2d(Chid, Chid, 3, groups=Chid, bias=False): (Chid,1,3,3) -> (3,3,Chid)
        "w_dw_hid": n(ks[5], (3, 3, chid)),
        # 1x1 gate convs (bias=False), (out, in)
        "w_bi": n(ks[6], (chid, chid)),
        "w_bf": n(ks[7], (chid, chid)),
        "w_bc": n(ks[8], (chid, chid)),
        "w_bo": n(ks[9], (chid, chid)),
    }


if __name__ == "__main__":
    # T == BottleneckLSTM(batch_size=4); HW = 128 -> activations are lane-dense.
    T, Cin, Chid, H, W = 4, 8, 16, 16, 8

    key = jax.random.PRNGKey(0)
    k_p, k_x, k_h, k_c = jax.random.split(key, 4)
    params = make_params(k_p, Cin, Chid)
    x = jax.random.normal(k_x, (T, Cin, H, W), jnp.float32)
    h0 = 0.5 * jax.random.normal(k_h, (Chid, H, W), jnp.float32)
    c0 = 0.5 * jax.random.normal(k_c, (Chid, H, W), jnp.float32)

    run = jax.jit(bottleneck_lstm)
    h_out, c_out = jax.block_until_ready(run(x, h0, c0, params))

    h_ref, c_ref = bottleneck_lstm_ref(x, h0, c0, params)
    assert h_out.shape == (T, Chid, H, W) and c_out.shape == (T, Chid, H, W)
    assert jnp.allclose(h_out, h_ref, rtol=1e-3, atol=1e-3), "hidden state mismatch"
    assert jnp.allclose(c_out, c_ref, rtol=1e-3, atol=1e-3), "cell state mismatch"

    print("KERNEL_OK")
</pallas_src>

<mosaic_0001>
module attributes {stable_mosaic.version = 11 : i64} {
  func.func @_bottleneck_lstm_kernel(%arg0: i32, %arg1: memref<8x512xf32, #tpu.memory_space<vmem>>, %arg2: memref<16x128xf32, #tpu.memory_space<vmem>>, %arg3: memref<16x128xf32, #tpu.memory_space<vmem>>, %arg4: memref<9x512xf32, #tpu.memory_space<vmem>>, %arg5: memref<16x72xf32, #tpu.memory_space<vmem>>, %arg6: memref<16x1xf32, #tpu.memory_space<vmem>>, %arg7: memref<16x16xf32, #tpu.memory_space<vmem>>, %arg8: memref<64x144xf32, #tpu.memory_space<vmem>>, %arg9: memref<4x16x128xf32, #tpu.memory_space<vmem>>, %arg10: memref<4x16x128xf32, #tpu.memory_space<vmem>>, %arg11: memref<4x16x128xf32, #tpu.memory_space<vmem>>) attributes {dimension_semantics = [#tpu.dimension_semantics<arbitrary>], iteration_bounds = array<i64: 1>, scalar_prefetch = 0 : i64, scratch_operands = 1 : i64, tpu.core_type = #tpu.core_type<tc>, window_params = [{pipeline_mode = #tpu.pipeline_mode<synchronous>, transform_indices = @transform_0, window_bounds = array<i64: 8, 512>}, {pipeline_mode = #tpu.pipeline_mode<synchronous>, transform_indices = @transform_1, window_bounds = array<i64: 16, 128>}, {pipeline_mode = #tpu.pipeline_mode<synchronous>, transform_indices = @transform_2, window_bounds = array<i64: 16, 128>}, {pipeline_mode = #tpu.pipeline_mode<synchronous>, transform_indices = @transform_3, window_bounds = array<i64: 9, 512>}, {pipeline_mode = #tpu.pipeline_mode<synchronous>, transform_indices = @transform_4, window_bounds = array<i64: 16, 72>}, {pipeline_mode = #tpu.pipeline_mode<synchronous>, transform_indices = @transform_5, window_bounds = array<i64: 16, 1>}, {pipeline_mode = #tpu.pipeline_mode<synchronous>, transform_indices = @transform_6, window_bounds = array<i64: 16, 16>}, {pipeline_mode = #tpu.pipeline_mode<synchronous>, transform_indices = @transform_7, window_bounds = array<i64: 64, 144>}, {pipeline_mode = #tpu.pipeline_mode<synchronous>, transform_indices = @transform_8, window_bounds = array<i64: 4, 16, 128>}, {pipeline_mode = #tpu.pipeline_mode<synchronous>, transform_indices = @transform_9, window_bounds = array<i64: 4, 16, 128>}]} {
    %c0 = arith.constant 0 : index
    %c0_0 = arith.constant 0 : index
    %0 = vector.load %arg1[%c0, %c0_0] : memref<8x512xf32, #tpu.memory_space<vmem>>, vector<8x512xf32>
    %c9_i32 = arith.constant 9 : i32
    %1 = tpu.dynamic_rotate %0 by %c9_i32 dim 1 : vector<8x512xf32>, i32 -> vector<8x512xf32>
    %c0_1 = arith.constant 0 : index
    %c0_2 = arith.constant 0 : index
    %2 = vector.load %arg4[%c0_1, %c0_2] : memref<9x512xf32, #tpu.memory_space<vmem>>, vector<1x512xf32>
    %3 = vector.broadcast %2 : vector<1x512xf32> to vector<8x512xf32>
    %4 = arith.mulf %1, %3 : vector<8x512xf32>
    %c8_i32 = arith.constant 8 : i32
    %5 = tpu.dynamic_rotate %0 by %c8_i32 dim 1 : vector<8x512xf32>, i32 -> vector<8x512xf32>
    %c1 = arith.constant 1 : index
    %c0_3 = arith.constant 0 : index
    %6 = vector.load %arg4[%c1, %c0_3] : memref<9x512xf32, #tpu.memory_space<vmem>>, vector<1x512xf32>
    %7 = vector.broadcast %6 : vector<1x512xf32> to vector<8x512xf32>
    %8 = arith.mulf %5, %7 : vector<8x512xf32>
    %c7_i32 = arith.constant 7 : i32
    %9 = tpu.dynamic_rotate %0 by %c7_i32 dim 1 : vector<8x512xf32>, i32 -> vector<8x512xf32>
    %c2 = arith.constant 2 : index
    %c0_4 = arith.constant 0 : index
    %10 = vector.load %arg4[%c2, %c0_4] : memref<9x512xf32, #tpu.memory_space<vmem>>, vector<1x512xf32>
    %11 = vector.broadcast %10 : vector<1x512xf32> to vector<8x512xf32>
    %12 = arith.mulf %9, %11 : vector<8x512xf32>
    %c1_i32 = arith.constant 1 : i32
    %13 = tpu.dynamic_rotate %0 by %c1_i32 dim 1 : vector<8x512xf32>, i32 -> vector<8x512xf32>
    %c3 = arith.constant 3 : index
    %c0_5 = arith.constant 0 : index
    %14 = vector.load %arg4[%c3, %c0_5] : memref<9x512xf32, #tpu.memory_space<vmem>>, vector<1x512xf32>
    %15 = vector.broadcast %14 : vector<1x512xf32> to vector<8x512xf32>
    %16 = arith.mulf %13, %15 : vector<8x512xf32>
    %c511_i32 = arith.constant 511 : i32
    %17 = tpu.dynamic_rotate %0 by %c511_i32 dim 1 : vector<8x512xf32>, i32 -> vector<8x512xf32>
    %c5 = arith.constant 5 : index
    %c0_6 = arith.constant 0 : index
    %18 = vector.load %arg4[%c5, %c0_6] : memref<9x512xf32, #tpu.memory_space<vmem>>, vector<1x512xf32>
    %19 = vector.broadcast %18 : vector<1x512xf32> to vector<8x512xf32>
    %20 = arith.mulf %17, %19 : vector<8x512xf32>
    %c505_i32 = arith.constant 505 : i32
    %21 = tpu.dynamic_rotate %0 by %c505_i32 dim 1 : vector<8x512xf32>, i32 -> vector<8x512xf32>
    %c6 = arith.constant 6 : index
    %c0_7 = arith.constant 0 : index
    %22 = vector.load %arg4[%c6, %c0_7] : memref<9x512xf32, #tpu.memory_space<vmem>>, vector<1x512xf32>
    %23 = vector.broadcast %22 : vector<1x512xf32> to vector<8x512xf32>
    %24 = arith.mulf %21, %23 : vector<8x512xf32>
    %c504_i32 = arith.constant 504 : i32
    %25 = tpu.dynamic_rotate %0 by %c504_i32 dim 1 : vector<8x512xf32>, i32 -> vector<8x512xf32>
    %c7 = arith.constant 7 : index
    %c0_8 = arith.constant 0 : index
    %26 = vector.load %arg4[%c7, %c0_8] : memref<9x512xf32, #tpu.memory_space<vmem>>, vector<1x512xf32>
    %27 = vector.broadcast %26 : vector<1x512xf32> to vector<8x512xf32>
    %28 = arith.mulf %25, %27 : vector<8x512xf32>
    %c503_i32 = arith.constant 503 : i32
    %29 = tpu.dynamic_rotate %0 by %c503_i32 dim 1 : vector<8x512xf32>, i32 -> vector<8x512xf32>
    %c8 = arith.constant 8 : index
    %c0_9 = arith.constant 0 : index
    %30 = vector.load %arg4[%c8, %c0_9] : memref<9x512xf32, #tpu.memory_space<vmem>>, vector<1x512xf32>
    %31 = vector.broadcast %30 : vector<1x512xf32> to vector<8x512xf32>
    %32 = arith.mulf %29, %31 : vector<8x512xf32>
    %33 = tpu.concatenate %4, %8, %12, %16, %0, %20, %24, %28, %32 in 0 : vector<8x512xf32>, vector<8x512xf32>, vector<8x512xf32>, vector<8x512xf32>, vector<8x512xf32>, vector<8x512xf32>, vector<8x512xf32>, vector<8x512xf32>, vector<8x512xf32> -> vector<72x512xf32>
    %c0_10 = arith.constant 0 : index
    %c0_11 = arith.constant 0 : index
    %34 = vector.load %arg5[%c0_10, %c0_11] : memref<16x72xf32, #tpu.memory_space<vmem>>, vector<16x72xf32>
    %cst = arith.constant dense<0.000000e+00> : vector<16x512xf32>
    %35 = tpu.matmul %34, %33, %cst {dimension_numbers = #tpu.dot_dimension_numbers<[1], [0], [0], [1], [0, 0, 1, 1], [], []>} : vector<16x72xf32>, vector<72x512xf32>, vector<16x512xf32> -> vector<16x512xf32>
    %c0_12 = arith.constant 0 : index
    %c0_13 = arith.constant 0 : index
    %36 = vector.load %arg6[%c0_12, %c0_13] : memref<16x1xf32, #tpu.memory_space<vmem>>, vector<16x1xf32>
    %37 = vector.broadcast %36 : vector<16x1xf32> to vector<16x512xf32>
    %38 = arith.addf %35, %37 : vector<16x512xf32>
    %39 = vector.extract_strided_slice %38 {offsets = [0, 0], sizes = [16, 128], strides = [1, 1]} : vector<16x512xf32> to vector<16x128xf32>
    %c0_14 = arith.constant 0 : index
    %c0_15 = arith.constant 0 : index
    %c0_16 = arith.constant 0 : index
    %40 = vector.load %arg11[%c0_14, %c0_15, %c0_16] : memref<4x16x128xf32, #tpu.memory_space<vmem>>, vector<1x16x128xf32>
    %41 = vector.shape_cast %40 : vector<1x16x128xf32> to vector<16x128xf32>
    %42 = vector.shape_cast %39 : vector<16x128xf32> to vector<1x16x128xf32>
    tpu.vector_store %arg11[%c0_14, %c0_15, %c0_16], %42 {strides = array<i32>} : memref<4x16x128xf32, #tpu.memory_space<vmem>>, vector<1x16x128xf32>,
    %43 = vector.extract_strided_slice %38 {offsets = [0, 128], sizes = [16, 128], strides = [1, 1]} : vector<16x512xf32> to vector<16x128xf32>
    %c1_17 = arith.constant 1 : index
    %c0_18 = arith.constant 0 : index
    %c0_19 = arith.constant 0 : index
    %44 = vector.load %arg11[%c1_17, %c0_18, %c0_19] : memref<4x16x128xf32, #tpu.memory_space<vmem>>, vector<1x16x128xf32>
    %45 = vector.shape_cast %44 : vector<1x16x128xf32> to vector<16x128xf32>
    %46 = vector.shape_cast %43 : vector<16x128xf32> to vector<1x16x128xf32>
    tpu.vector_store %arg11[%c1_17, %c0_18, %c0_19], %46 {strides = array<i32>} : memref<4x16x128xf32, #tpu.memory_space<vmem>>, vector<1x16x128xf32>,
    %47 = vector.extract_strided_slice %38 {offsets = [0, 256], sizes = [16, 128], strides = [1, 1]} : vector<16x512xf32> to vector<16x128xf32>
    %c2_20 = arith.constant 2 : index
    %c0_21 = arith.constant 0 : index
    %c0_22 = arith.constant 0 : index
    %48 = vector.load %arg11[%c2_20, %c0_21, %c0_22] : memref<4x16x128xf32, #tpu.memory_space<vmem>>, vector<1x16x128xf32>
    %49 = vector.shape_cast %48 : vector<1x16x128xf32> to vector<16x128xf32>
    %50 = vector.shape_cast %47 : vector<16x128xf32> to vector<1x16x128xf32>
    tpu.vector_store %arg11[%c2_20, %c0_21, %c0_22], %50 {strides = array<i32>} : memref<4x16x128xf32, #tpu.memory_space<vmem>>, vector<1x16x128xf32>,
    %51 = vector.extract_strided_slice %38 {offsets = [0, 384], sizes = [16, 128], strides = [1, 1]} : vector<16x512xf32> to vector<16x128xf32>
    %c3_23 = arith.constant 3 : index
    %c0_24 = arith.constant 0 : index
    %c0_25 = arith.constant 0 : index
    %52 = vector.load %arg11[%c3_23, %c0_24, %c0_25] : memref<4x16x128xf32, #tpu.memory_space<vmem>>, vector<1x16x128xf32>
    %53 = vector.shape_cast %52 : vector<1x16x128xf32> to vector<16x128xf32>
    %54 = vector.shape_cast %51 : vector<16x128xf32> to vector<1x16x128xf32>
    tpu.vector_store %arg11[%c3_23, %c0_24, %c0_25], %54 {strides = array<i32>} : memref<4x16x128xf32, #tpu.memory_space<vmem>>, vector<1x16x128xf32>,
    %c0_26 = arith.constant 0 : index
    %c0_27 = arith.constant 0 : index
    %55 = vector.load %arg7[%c0_26, %c0_27] : memref<16x16xf32, #tpu.memory_space<vmem>>, vector<16x16xf32>
    %c0_28 = arith.constant 0 : index
    %c0_29 = arith.constant 0 : index
    %56 = vector.load %arg8[%c0_28, %c0_29] : memref<64x144xf32, #tpu.memory_space<vmem>>, vector<64x144xf32>
    %c0_30 = arith.constant 0 : index
    %c0_31 = arith.constant 0 : index
    %57 = vector.load %arg2[%c0_30, %c0_31] : memref<16x128xf32, #tpu.memory_space<vmem>>, vector<16x128xf32>
    %c0_32 = arith.constant 0 : index
    %c0_33 = arith.constant 0 : index
    %58 = vector.load %arg3[%c0_32, %c0_33] : memref<16x128xf32, #tpu.memory_space<vmem>>, vector<16x128xf32>
    %c0_i32 = arith.constant 0 : i32
    %59 = arith.index_cast %c0_i32 : i32 to index
    %c0_34 = arith.constant 0 : index
    %c0_35 = arith.constant 0 : index
    %60 = vector.load %arg11[%59, %c0_34, %c0_35] : memref<4x16x128xf32, #tpu.memory_space<vmem>>, vector<1x16x128xf32>
    %61 = vector.shape_cast %60 : vector<1x16x128xf32> to vector<16x128xf32>
    %cst_36 = arith.constant dense<0.000000e+00> : vector<16x128xf32>
    %62 = tpu.matmul %55, %57, %cst_36 {dimension_numbers = #tpu.dot_dimension_numbers<[1], [0], [0], [1], [0, 0, 1, 1], [], []>} : vector<16x16xf32>, vector<16x128xf32>, vector<16x128xf32> -> vector<16x128xf32>
    %63 = arith.addf %61, %62 : vector<16x128xf32>
    %c9_i32_37 = arith.constant 9 : i32
    %64 = tpu.dynamic_rotate %63 by %c9_i32_37 dim 1 : vector<16x128xf32>, i32 -> vector<16x128xf32>
    %c0_38 = arith.constant 0 : index
    %c0_39 = arith.constant 0 : index
    %65 = vector.load %arg4[%c0_38, %c0_39] : memref<9x512xf32, #tpu.memory_space<vmem>>, vector<1x128xf32>
    %66 = vector.broadcast %65 : vector<1x128xf32> to vector<16x128xf32>
    %67 = arith.mulf %64, %66 : vector<16x128xf32>
    %c8_i32_40 = arith.constant 8 : i32
    %68 = tpu.dynamic_rotate %63 by %c8_i32_40 dim 1 : vector<16x128xf32>, i32 -> vector<16x128xf32>
    %c1_41 = arith.constant 1 : index
    %c0_42 = arith.constant 0 : index
    %69 = vector.load %arg4[%c1_41, %c0_42] : memref<9x512xf32, #tpu.memory_space<vmem>>, vector<1x128xf32>
    %70 = vector.broadcast %69 : vector<1x128xf32> to vector<16x128xf32>
    %71 = arith.mulf %68, %70 : vector<16x128xf32>
    %c7_i32_43 = arith.constant 7 : i32
    %72 = tpu.dynamic_rotate %63 by %c7_i32_43 dim 1 : vector<16x128xf32>, i32 -> vector<16x128xf32>
    %c2_44 = arith.constant 2 : index
    %c0_45 = arith.constant 0 : index
    %73 = vector.load %arg4[%c2_44, %c0_45] : memref<9x512xf32, #tpu.memory_space<vmem>>, vector<1x128xf32>
    %74 = vector.broadcast %73 : vector<1x128xf32> to vector<16x128xf32>
    %75 = arith.mulf %72, %74 : vector<16x128xf32>
    %c1_i32_46 = arith.constant 1 : i32
    %76 = tpu.dynamic_rotate %63 by %c1_i32_46 dim 1 : vector<16x128xf32>, i32 -> vector<16x128xf32>
    %c3_47 = arith.constant 3 : index
    %c0_48 = arith.constant 0 : index
    %77 = vector.load %arg4[%c3_47, %c0_48] : memref<9x512xf32, #tpu.memory_space<vmem>>, vector<1x128xf32>
    %78 = vector.broadcast %77 : vector<1x128xf32> to vector<16x128xf32>
    %79 = arith.mulf %76, %78 : vector<16x128xf32>
    %c127_i32 = arith.constant 127 : i32
    %80 = tpu.dynamic_rotate %63 by %c127_i32 dim 1 : vector<16x128xf32>, i32 -> vector<16x128xf32>
    %c5_49 = arith.constant 5 : index
    %c0_50 = arith.constant 0 : index
    %81 = vector.load %arg4[%c5_49, %c0_50] : memref<9x512xf32, #tpu.memory_space<vmem>>, vector<1x128xf32>
    %82 = vector.broadcast %81 : vector<1x128xf32> to vector<16x128xf32>
    %83 = arith.mulf %80, %82 : vector<16x128xf32>
    %c121_i32 = arith.constant 121 : i32
    %84 = tpu.dynamic_rotate %63 by %c121_i32 dim 1 : vector<16x128xf32>, i32 -> vector<16x128xf32>
    %c6_51 = arith.constant 6 : index
    %c0_52 = arith.constant 0 : index
    %85 = vector.load %arg4[%c6_51, %c0_52] : memref<9x512xf32, #tpu.memory_space<vmem>>, vector<1x128xf32>
    %86 = vector.broadcast %85 : vector<1x128xf32> to vector<16x128xf32>
    %87 = arith.mulf %84, %86 : vector<16x128xf32>
    %c120_i32 = arith.constant 120 : i32
    %88 = tpu.dynamic_rotate %63 by %c120_i32 dim 1 : vector<16x128xf32>, i32 -> vector<16x128xf32>
    %c7_53 = arith.constant 7 : index
    %c0_54 = arith.constant 0 : index
    %89 = vector.load %arg4[%c7_53, %c0_54] : memref<9x512xf32, #tpu.memory_space<vmem>>, vector<1x128xf32>
    %90 = vector.broadcast %89 : vector<1x128xf32> to vector<16x128xf32>
    %91 = arith.mulf %88, %90 : vector<16x128xf32>
    %c119_i32 = arith.constant 119 : i32
    %92 = tpu.dynamic_rotate %63 by %c119_i32 dim 1 : vector<16x128xf32>, i32 -> vector<16x128xf32>
    %c8_55 = arith.constant 8 : index
    %c0_56 = arith.constant 0 : index
    %93 = vector.load %arg4[%c8_55, %c0_56] : memref<9x512xf32, #tpu.memory_space<vmem>>, vector<1x128xf32>
    %94 = vector.broadcast %93 : vector<1x128xf32> to vector<16x128xf32>
    %95 = arith.mulf %92, %94 : vector<16x128xf32>
    %96 = tpu.concatenate %67, %71, %75, %79, %63, %83, %87, %91, %95 in 0 : vector<16x128xf32>, vector<16x128xf32>, vector<16x128xf32>, vector<16x128xf32>, vector<16x128xf32>, vector<16x128xf32>, vector<16x128xf32>, vector<16x128xf32>, vector<16x128xf32> -> vector<144x128xf32>
    %cst_57 = arith.constant dense<0.000000e+00> : vector<64x128xf32>
    %97 = tpu.matmul %56, %96, %cst_57 {dimension_numbers = #tpu.dot_dimension_numbers<[1], [0], [0], [1], [0, 0, 1, 1], [], []>} : vector<64x144xf32>, vector<144x128xf32>, vector<64x128xf32> -> vector<64x128xf32>
    %98 = vector.extract_strided_slice %97 {offsets = [0, 0], sizes = [48, 128], strides = [1, 1]} : vector<64x128xf32> to vector<48x128xf32>
    %99 = arith.negf %98 : vector<48x128xf32>
    %100 = math.exp %99 : vector<48x128xf32>
    %cst_58 = arith.constant 1.000000e+00 : f32
    %101 = vector.broadcast %cst_58 : f32 to vector<48x128xf32>
    %102 = arith.addf %101, %100 : vector<48x128xf32>
    %103 = arith.divf %101, %102 : vector<48x128xf32>
    %104 = vector.extract_strided_slice %103 {offsets = [0, 0], sizes = [16, 128], strides = [1, 1]} : vector<48x128xf32> to vector<16x128xf32>
    %105 = vector.extract_strided_slice %103 {offsets = [16, 0], sizes = [16, 128], strides = [1, 1]} : vector<48x128xf32> to vector<16x128xf32>
    %106 = vector.extract_strided_slice %103 {offsets = [32, 0], sizes = [16, 128], strides = [1, 1]} : vector<48x128xf32> to vector<16x128xf32>
    %107 = vector.extract_strided_slice %97 {offsets = [48, 0], sizes = [16, 128], strides = [1, 1]} : vector<64x128xf32> to vector<16x128xf32>
    %cst_59 = arith.constant 0.000000e+00 : f32
    %cst_60 = arith.constant 6.000000e+00 : f32
    %108 = vector.broadcast %cst_59 : f32 to vector<16x128xf32>
    %109 = arith.maximumf %108, %107 : vector<16x128xf32>
    %110 = vector.broadcast %cst_60 : f32 to vector<16x128xf32>
    %111 = arith.minimumf %110, %109 : vector<16x128xf32>
    %112 = arith.mulf %105, %58 : vector<16x128xf32>
    %113 = arith.mulf %104, %111 : vector<16x128xf32>
    %114 = arith.addf %112, %113 : vector<16x128xf32>
    %cst_61 = arith.constant 0.000000e+00 : f32
    %cst_62 = arith.constant 6.000000e+00 : f32
    %115 = vector.broadcast %cst_61 : f32 to vector<16x128xf32>
    %116 = arith.maximumf %115, %114 : vector<16x128xf32>
    %117 = vector.broadcast %cst_62 : f32 to vector<16x128xf32>
    %118 = arith.minimumf %117, %116 : vector<16x128xf32>
    %119 = arith.mulf %106, %118 : vector<16x128xf32>
    %120 = arith.index_cast %c0_i32 : i32 to index
    %c0_63 = arith.constant 0 : index
    %c0_64 = arith.constant 0 : index
    %121 = vector.load %arg9[%120, %c0_63, %c0_64] : memref<4x16x128xf32, #tpu.memory_space<vmem>>, vector<1x16x128xf32>
    %122 = vector.shape_cast %121 : vector<1x16x128xf32> to vector<16x128xf32>
    %123 = vector.shape_cast %119 : vector<16x128xf32> to vector<1x16x128xf32>
    tpu.vector_store %arg9[%120, %c0_63, %c0_64], %123 {strides = array<i32>} : memref<4x16x128xf32, #tpu.memory_space<vmem>>, vector<1x16x128xf32>,
    %124 = arith.index_cast %c0_i32 : i32 to index
    %c0_65 = arith.constant 0 : index
    %c0_66 = arith.constant 0 : index
    %125 = vector.load %arg10[%124, %c0_65, %c0_66] : memref<4x16x128xf32, #tpu.memory_space<vmem>>, vector<1x16x128xf32>
    %126 = vector.shape_cast %125 : vector<1x16x128xf32> to vector<16x128xf32>
    %127 = vector.shape_cast %114 : vector<16x128xf32> to vector<1x16x128xf32>
    tpu.vector_store %arg10[%124, %c0_65, %c0_66], %127 {strides = array<i32>} : memref<4x16x128xf32, #tpu.memory_space<vmem>>, vector<1x16x128xf32>,
    %c1_i32_67 = arith.constant 1 : i32
    %128 = arith.index_cast %c1_i32_67 : i32 to index
    %c0_68 = arith.constant 0 : index
    %c0_69 = arith.constant 0 : index
    %129 = vector.load %arg11[%128, %c0_68, %c0_69] : memref<4x16x128xf32, #tpu.memory_space<vmem>>, vector<1x16x128xf32>
    %130 = vector.shape_cast %129 : vector<1x16x128xf32> to vector<16x128xf32>
    %cst_70 = arith.constant dense<0.000000e+00> : vector<16x128xf32>
    %131 = tpu.matmul %55, %119, %cst_70 {dimension_numbers = #tpu.dot_dimension_numbers<[1], [0], [0], [1], [0, 0, 1, 1], [], []>} : vector<16x16xf32>, vector<16x128xf32>, vector<16x128xf32> -> vector<16x128xf32>
    %132 = arith.addf %130, %131 : vector<16x128xf32>
    %c9_i32_71 = arith.constant 9 : i32
    %133 = tpu.dynamic_rotate %132 by %c9_i32_71 dim 1 : vector<16x128xf32>, i32 -> vector<16x128xf32>
    %c0_72 = arith.constant 0 : index
    %c0_73 = arith.constant 0 : index
    %134 = vector.load %arg4[%c0_72, %c0_73] : memref<9x512xf32, #tpu.memory_space<vmem>>, vector<1x128xf32>
    %135 = vector.broadcast %134 : vector<1x128xf32> to vector<16x128xf32>
    %136 = arith.mulf %133, %135 : vector<16x128xf32>
    %c8_i32_74 = arith.constant 8 : i32
    %137 = tpu.dynamic_rotate %132 by %c8_i32_74 dim 1 : vector<16x128xf32>, i32 -> vector<16x128xf32>
    %c1_75 = arith.constant 1 : index
    %c0_76 = arith.constant 0 : index
    %138 = vector.load %arg4[%c1_75, %c0_76] : memref<9x512xf32, #tpu.memory_space<vmem>>, vector<1x128xf32>
    %139 = vector.broadcast %138 : vector<1x128xf32> to vector<16x128xf32>
    %140 = arith.mulf %137, %139 : vector<16x128xf32>
    %c7_i32_77 = arith.constant 7 : i32
    %141 = tpu.dynamic_rotate %132 by %c7_i32_77 dim 1 : vector<16x128xf32>, i32 -> vector<16x128xf32>
    %c2_78 = arith.constant 2 : index
    %c0_79 = arith.constant 0 : index
    %142 = vector.load %arg4[%c2_78, %c0_79] : memref<9x512xf32, #tpu.memory_space<vmem>>, vector<1x128xf32>
    %143 = vector.broadcast %142 : vector<1x128xf32> to vector<16x128xf32>
    %144 = arith.mulf %141, %143 : vector<16x128xf32>
    %c1_i32_80 = arith.constant 1 : i32
    %145 = tpu.dynamic_rotate %132 by %c1_i32_80 dim 1 : vector<16x128xf32>, i32 -> vector<16x128xf32>
    %c3_81 = arith.constant 3 : index
    %c0_82 = arith.constant 0 : index
    %146 = vector.load %arg4[%c3_81, %c0_82] : memref<9x512xf32, #tpu.memory_space<vmem>>, vector<1x128xf32>
    %147 = vector.broadcast %146 : vector<1x128xf32> to vector<16x128xf32>
    %148 = arith.mulf %145, %147 : vector<16x128xf32>
    %c127_i32_83 = arith.constant 127 : i32
    %149 = tpu.dynamic_rotate %132 by %c127_i32_83 dim 1 : vector<16x128xf32>, i32 -> vector<16x128xf32>
    %c5_84 = arith.constant 5 : index
    %c0_85 = arith.constant 0 : index
    %150 = vector.load %arg4[%c5_84, %c0_85] : memref<9x512xf32, #tpu.memory_space<vmem>>, vector<1x128xf32>
    %151 = vector.broadcast %150 : vector<1x128xf32> to vector<16x128xf32>
    %152 = arith.mulf %149, %151 : vector<16x128xf32>
    %c121_i32_86 = arith.constant 121 : i32
    %153 = tpu.dynamic_rotate %132 by %c121_i32_86 dim 1 : vector<16x128xf32>, i32 -> vector<16x128xf32>
    %c6_87 = arith.constant 6 : index
    %c0_88 = arith.constant 0 : index
    %154 = vector.load %arg4[%c6_87, %c0_88] : memref<9x512xf32, #tpu.memory_space<vmem>>, vector<1x128xf32>
    %155 = vector.broadcast %154 : vector<1x128xf32> to vector<16x128xf32>
    %156 = arith.mulf %153, %155 : vector<16x128xf32>
    %c120_i32_89 = arith.constant 120 : i32
    %157 = tpu.dynamic_rotate %132 by %c120_i32_89 dim 1 : vector<16x128xf32>, i32 -> vector<16x128xf32>
    %c7_90 = arith.constant 7 : index
    %c0_91 = arith.constant 0 : index
    %158 = vector.load %arg4[%c7_90, %c0_91] : memref<9x512xf32, #tpu.memory_space<vmem>>, vector<1x128xf32>
    %159 = vector.broadcast %158 : vector<1x128xf32> to vector<16x128xf32>
    %160 = arith.mulf %157, %159 : vector<16x128xf32>
    %c119_i32_92 = arith.constant 119 : i32
    %161 = tpu.dynamic_rotate %132 by %c119_i32_92 dim 1 : vector<16x128xf32>, i32 -> vector<16x128xf32>
    %c8_93 = arith.constant 8 : index
    %c0_94 = arith.constant 0 : index
    %162 = vector.load %arg4[%c8_93, %c0_94] : memref<9x512xf32, #tpu.memory_space<vmem>>, vector<1x128xf32>
    %163 = vector.broadcast %162 : vector<1x128xf32> to vector<16x128xf32>
    %164 = arith.mulf %161, %163 : vector<16x128xf32>
    %165 = tpu.concatenate %136, %140, %144, %148, %132, %152, %156, %160, %164 in 0 : vector<16x128xf32>, vector<16x128xf32>, vector<16x128xf32>, vector<16x128xf32>, vector<16x128xf32>, vector<16x128xf32>, vector<16x128xf32>, vector<16x128xf32>, vector<16x128xf32> -> vector<144x128xf32>
    %cst_95 = arith.constant dense<0.000000e+00> : vector<64x128xf32>
    %166 = tpu.matmul %56, %165, %cst_95 {dimension_numbers = #tpu.dot_dimension_numbers<[1], [0], [0], [1], [0, 0, 1, 1], [], []>} : vector<64x144xf32>, vector<144x128xf32>, vector<64x128xf32> -> vector<64x128xf32>
    %167 = vector.extract_strided_slice %166 {offsets = [0, 0], sizes = [48, 128], strides = [1, 1]} : vector<64x128xf32> to vector<48x128xf32>
    %168 = arith.negf %167 : vector<48x128xf32>
    %169 = math.exp %168 : vector<48x128xf32>
    %cst_96 = arith.constant 1.000000e+00 : f32
    %170 = vector.broadcast %cst_96 : f32 to vector<48x128xf32>
    %171 = arith.addf %170, %169 : vector<48x128xf32>
    %172 = arith.divf %170, %171 : vector<48x128xf32>
    %173 = vector.extract_strided_slice %172 {offsets = [0, 0], sizes = [16, 128], strides = [1, 1]} : vector<48x128xf32> to vector<16x128xf32>
    %174 = vector.extract_strided_slice %172 {offsets = [16, 0], sizes = [16, 128], strides = [1, 1]} : vector<48x128xf32> to vector<16x128xf32>
    %175 = vector.extract_strided_slice %172 {offsets = [32, 0], sizes = [16, 128], strides = [1, 1]} : vector<48x128xf32> to vector<16x128xf32>
    %176 = vector.extract_strided_slice %166 {offsets = [48, 0], sizes = [16, 128], strides = [1, 1]} : vector<64x128xf32> to vector<16x128xf32>
    %cst_97 = arith.constant 0.000000e+00 : f32
    %cst_98 = arith.constant 6.000000e+00 : f32
    %177 = vector.broadcast %cst_97 : f32 to vector<16x128xf32>
    %178 = arith.maximumf %177, %176 : vector<16x128xf32>
    %179 = vector.broadcast %cst_98 : f32 to vector<16x128xf32>
    %180 = arith.minimumf %179, %178 : vector<16x128xf32>
    %181 = arith.mulf %174, %114 : vector<16x128xf32>
    %182 = arith.mulf %173, %180 : vector<16x128xf32>
    %183 = arith.addf %181, %182 : vector<16x128xf32>
    %cst_99 = arith.constant 0.000000e+00 : f32
    %cst_100 = arith.constant 6.000000e+00 : f32
    %184 = vector.broadcast %cst_99 : f32 to vector<16x128xf32>
    %185 = arith.maximumf %184, %183 : vector<16x128xf32>
    %186 = vector.broadcast %cst_100 : f32 to vector<16x128xf32>
    %187 = arith.minimumf %186, %185 : vector<16x128xf32>
    %188 = arith.mulf %175, %187 : vector<16x128xf32>
    %189 = arith.index_cast %c1_i32_67 : i32 to index
    %c0_101 = arith.constant 0 : index
    %c0_102 = arith.constant 0 : index
    %190 = vector.load %arg9[%189, %c0_101, %c0_102] : memref<4x16x128xf32, #tpu.memory_space<vmem>>, vector<1x16x128xf32>
    %191 = vector.shape_cast %190 : vector<1x16x128xf32> to vector<16x128xf32>
    %192 = vector.shape_cast %188 : vector<16x128xf32> to vector<1x16x128xf32>
    tpu.vector_store %arg9[%189, %c0_101, %c0_102], %192 {strides = array<i32>} : memref<4x16x128xf32, #tpu.memory_space<vmem>>, vector<1x16x128xf32>,
    %193 = arith.index_cast %c1_i32_67 : i32 to index
    %c0_103 = arith.constant 0 : index
    %c0_104 = arith.constant 0 : index
    %194 = vector.load %arg10[%193, %c0_103, %c0_104] : memref<4x16x128xf32, #tpu.memory_space<vmem>>, vector<1x16x128xf32>
    %195 = vector.shape_cast %194 : vector<1x16x128xf32> to vector<16x128xf32>
    %196 = vector.shape_cast %183 : vector<16x128xf32> to vector<1x16x128xf32>
    tpu.vector_store %arg10[%193, %c0_103, %c0_104], %196 {strides = array<i32>} : memref<4x16x128xf32, #tpu.memory_space<vmem>>, vector<1x16x128xf32>,
    %c2_i32 = arith.constant 2 : i32
    %197 = arith.index_cast %c2_i32 : i32 to index
    %c0_105 = arith.constant 0 : index
    %c0_106 = arith.constant 0 : index
    %198 = vector.load %arg11[%197, %c0_105, %c0_106] : memref<4x16x128xf32, #tpu.memory_space<vmem>>, vector<1x16x128xf32>
    %199 = vector.shape_cast %198 : vector<1x16x128xf32> to vector<16x128xf32>
    %cst_107 = arith.constant dense<0.000000e+00> : vector<16x128xf32>
    %200 = tpu.matmul %55, %188, %cst_107 {dimension_numbers = #tpu.dot_dimension_numbers<[1], [0], [0], [1], [0, 0, 1, 1], [], []>} : vector<16x16xf32>, vector<16x128xf32>, vector<16x128xf32> -> vector<16x128xf32>
    %201 = arith.addf %199, %200 : vector<16x128xf32>
    %c9_i32_108 = arith.constant 9 : i32
    %202 = tpu.dynamic_rotate %201 by %c9_i32_108 dim 1 : vector<16x128xf32>, i32 -> vector<16x128xf32>
    %c0_109 = arith.constant 0 : index
    %c0_110 = arith.constant 0 : index
    %203 = vector.load %arg4[%c0_109, %c0_110] : memref<9x512xf32, #tpu.memory_space<vmem>>, vector<1x128xf32>
    %204 = vector.broadcast %203 : vector<1x128xf32> to vector<16x128xf32>
    %205 = arith.mulf %202, %204 : vector<16x128xf32>
    %c8_i32_111 = arith.constant 8 : i32
    %206 = tpu.dynamic_rotate %201 by %c8_i32_111 dim 1 : vector<16x128xf32>, i32 -> vector<16x128xf32>
    %c1_112 = arith.constant 1 : index
    %c0_113 = arith.constant 0 : index
    %207 = vector.load %arg4[%c1_112, %c0_113] : memref<9x512xf32, #tpu.memory_space<vmem>>, vector<1x128xf32>
    %208 = vector.broadcast %207 : vector<1x128xf32> to vector<16x128xf32>
    %209 = arith.mulf %206, %208 : vector<16x128xf32>
    %c7_i32_114 = arith.constant 7 : i32
    %210 = tpu.dynamic_rotate %201 by %c7_i32_114 dim 1 : vector<16x128xf32>, i32 -> vector<16x128xf32>
    %c2_115 = arith.constant 2 : index
    %c0_116 = arith.constant 0 : index
    %211 = vector.load %arg4[%c2_115, %c0_116] : memref<9x512xf32, #tpu.memory_space<vmem>>, vector<1x128xf32>
    %212 = vector.broadcast %211 : vector<1x128xf32> to vector<16x128xf32>
    %213 = arith.mulf %210, %212 : vector<16x128xf32>
    %c1_i32_117 = arith.constant 1 : i32
    %214 = tpu.dynamic_rotate %201 by %c1_i32_117 dim 1 : vector<16x128xf32>, i32 -> vector<16x128xf32>
    %c3_118 = arith.constant 3 : index
    %c0_119 = arith.constant 0 : index
    %215 = vector.load %arg4[%c3_118, %c0_119] : memref<9x512xf32, #tpu.memory_space<vmem>>, vector<1x128xf32>
    %216 = vector.broadcast %215 : vector<1x128xf32> to vector<16x128xf32>
    %217 = arith.mulf %214, %216 : vector<16x128xf32>
    %c127_i32_120 = arith.constant 127 : i32
    %218 = tpu.dynamic_rotate %201 by %c127_i32_120 dim 1 : vector<16x128xf32>, i32 -> vector<16x128xf32>
    %c5_121 = arith.constant 5 : index
    %c0_122 = arith.constant 0 : index
    %219 = vector.load %arg4[%c5_121, %c0_122] : memref<9x512xf32, #tpu.memory_space<vmem>>, vector<1x128xf32>
    %220 = vector.broadcast %219 : vector<1x128xf32> to vector<16x128xf32>
    %221 = arith.mulf %218, %220 : vector<16x128xf32>
    %c121_i32_123 = arith.constant 121 : i32
    %222 = tpu.dynamic_rotate %201 by %c121_i32_123 dim 1 : vector<16x128xf32>, i32 -> vector<16x128xf32>
    %c6_124 = arith.constant 6 : index
    %c0_125 = arith.constant 0 : index
    %223 = vector.load %arg4[%c6_124, %c0_125] : memref<9x512xf32, #tpu.memory_space<vmem>>, vector<1x128xf32>
    %224 = vector.broadcast %223 : vector<1x128xf32> to vector<16x128xf32>
    %225 = arith.mulf %222, %224 : vector<16x128xf32>
    %c120_i32_126 = arith.constant 120 : i32
    %226 = tpu.dynamic_rotate %201 by %c120_i32_126 dim 1 : vector<16x128xf32>, i32 -> vector<16x128xf32>
    %c7_127 = arith.constant 7 : index
    %c0_128 = arith.constant 0 : index
    %227 = vector.load %arg4[%c7_127, %c0_128] : memref<9x512xf32, #tpu.memory_space<vmem>>, vector<1x128xf32>
    %228 = vector.broadcast %227 : vector<1x128xf32> to vector<16x128xf32>
    %229 = arith.mulf %226, %228 : vector<16x128xf32>
    %c119_i32_129 = arith.constant 119 : i32
    %230 = tpu.dynamic_rotate %201 by %c119_i32_129 dim 1 : vector<16x128xf32>, i32 -> vector<16x128xf32>
    %c8_130 = arith.constant 8 : index
    %c0_131 = arith.constant 0 : index
    %231 = vector.load %arg4[%c8_130, %c0_131] : memref<9x512xf32, #tpu.memory_space<vmem>>, vector<1x128xf32>
    %232 = vector.broadcast %231 : vector<1x128xf32> to vector<16x128xf32>
    %233 = arith.mulf %230, %232 : vector<16x128xf32>
    %234 = tpu.concatenate %205, %209, %213, %217, %201, %221, %225, %229, %233 in 0 : vector<16x128xf32>, vector<16x128xf32>, vector<16x128xf32>, vector<16x128xf32>, vector<16x128xf32>, vector<16x128xf32>, vector<16x128xf32>, vector<16x128xf32>, vector<16x128xf32> -> vector<144x128xf32>
    %cst_132 = arith.constant dense<0.000000e+00> : vector<64x128xf32>
    %235 = tpu.matmul %56, %234, %cst_132 {dimension_numbers = #tpu.dot_dimension_numbers<[1], [0], [0], [1], [0, 0, 1, 1], [], []>} : vector<64x144xf32>, vector<144x128xf32>, vector<64x128xf32> -> vector<64x128xf32>
    %236 = vector.extract_strided_slice %235 {offsets = [0, 0], sizes = [48, 128], strides = [1, 1]} : vector<64x128xf32> to vector<48x128xf32>
    %237 = arith.negf %236 : vector<48x128xf32>
    %238 = math.exp %237 : vector<48x128xf32>
    %cst_133 = arith.constant 1.000000e+00 : f32
    %239 = vector.broadcast %cst_133 : f32 to vector<48x128xf32>
    %240 = arith.addf %239, %238 : vector<48x128xf32>
    %241 = arith.divf %239, %240 : vector<48x128xf32>
    %242 = vector.extract_strided_slice %241 {offsets = [0, 0], sizes = [16, 128], strides = [1, 1]} : vector<48x128xf32> to vector<16x128xf32>
    %243 = vector.extract_strided_slice %241 {offsets = [16, 0], sizes = [16, 128], strides = [1, 1]} : vector<48x128xf32> to vector<16x128xf32>
    %244 = vector.extract_strided_slice %241 {offsets = [32, 0], sizes = [16, 128], strides = [1, 1]} : vector<48x128xf32> to vector<16x128xf32>
    %245 = vector.extract_strided_slice %235 {offsets = [48, 0], sizes = [16, 128], strides = [1, 1]} : vector<64x128xf32> to vector<16x128xf32>
    %cst_134 = arith.constant 0.000000e+00 : f32
    %cst_135 = arith.constant 6.000000e+00 : f32
    %246 = vector.broadcast %cst_134 : f32 to vector<16x128xf32>
    %247 = arith.maximumf %246, %245 : vector<16x128xf32>
    %248 = vector.broadcast %cst_135 : f32 to vector<16x128xf32>
    %249 = arith.minimumf %248, %247 : vector<16x128xf32>
    %250 = arith.mulf %243, %183 : vector<16x128xf32>
    %251 = arith.mulf %242, %249 : vector<16x128xf32>
    %252 = arith.addf %250, %251 : vector<16x128xf32>
    %cst_136 = arith.constant 0.000000e+00 : f32
    %cst_137 = arith.constant 6.000000e+00 : f32
    %253 = vector.broadcast %cst_136 : f32 to vector<16x128xf32>
    %254 = arith.maximumf %253, %252 : vector<16x128xf32>
    %255 = vector.broadcast %cst_137 : f32 to vector<16x128xf32>
    %256 = arith.minimumf %255, %254 : vector<16x128xf32>
    %257 = arith.mulf %244, %256 : vector<16x128xf32>
    %258 = arith.index_cast %c2_i32 : i32 to index
    %c0_138 = arith.constant 0 : index
    %c0_139 = arith.constant 0 : index
    %259 = vector.load %arg9[%258, %c0_138, %c0_139] : memref<4x16x128xf32, #tpu.memory_space<vmem>>, vector<1x16x128xf32>
    %260 = vector.shape_cast %259 : vector<1x16x128xf32> to vector<16x128xf32>
    %261 = vector.shape_cast %257 : vector<16x128xf32> to vector<1x16x128xf32>
    tpu.vector_store %arg9[%258, %c0_138, %c0_139], %261 {strides = array<i32>} : memref<4x16x128xf32, #tpu.memory_space<vmem>>, vector<1x16x128xf32>,
    %262 = arith.index_cast %c2_i32 : i32 to index
    %c0_140 = arith.constant 0 : index
    %c0_141 = arith.constant 0 : index
    %263 = vector.load %arg10[%262, %c0_140, %c0_141] : memref<4x16x128xf32, #tpu.memory_space<vmem>>, vector<1x16x128xf32>
    %264 = vector.shape_cast %263 : vector<1x16x128xf32> to vector<16x128xf32>
    %265 = vector.shape_cast %252 : vector<16x128xf32> to vector<1x16x128xf32>
    tpu.vector_store %arg10[%262, %c0_140, %c0_141], %265 {strides = array<i32>} : memref<4x16x128xf32, #tpu.memory_space<vmem>>, vector<1x16x128xf32>,
    %c3_i32 = arith.constant 3 : i32
    %266 = arith.index_cast %c3_i32 : i32 to index
    %c0_142 = arith.constant 0 : index
    %c0_143 = arith.constant 0 : index
    %267 = vector.load %arg11[%266, %c0_142, %c0_143] : memref<4x16x128xf32, #tpu.memory_space<vmem>>, vector<1x16x128xf32>
    %268 = vector.shape_cast %267 : vector<1x16x128xf32> to vector<16x128xf32>
    %cst_144 = arith.constant dense<0.000000e+00> : vector<16x128xf32>
    %269 = tpu.matmul %55, %257, %cst_144 {dimension_numbers = #tpu.dot_dimension_numbers<[1], [0], [0], [1], [0, 0, 1, 1], [], []>} : vector<16x16xf32>, vector<16x128xf32>, vector<16x128xf32> -> vector<16x128xf32>
    %270 = arith.addf %268, %269 : vector<16x128xf32>
    %c9_i32_145 = arith.constant 9 : i32
    %271 = tpu.dynamic_rotate %270 by %c9_i32_145 dim 1 : vector<16x128xf32>, i32 -> vector<16x128xf32>
    %c0_146 = arith.constant 0 : index
    %c0_147 = arith.constant 0 : index
    %272 = vector.load %arg4[%c0_146, %c0_147] : memref<9x512xf32, #tpu.memory_space<vmem>>, vector<1x128xf32>
    %273 = vector.broadcast %272 : vector<1x128xf32> to vector<16x128xf32>
    %274 = arith.mulf %271, %273 : vector<16x128xf32>
    %c8_i32_148 = arith.constant 8 : i32
    %275 = tpu.dynamic_rotate %270 by %c8_i32_148 dim 1 : vector<16x128xf32>, i32 -> vector<16x128xf32>
    %c1_149 = arith.constant 1 : index
    %c0_150 = arith.constant 0 : index
    %276 = vector.load %arg4[%c1_149, %c0_150] : memref<9x512xf32, #tpu.memory_space<vmem>>, vector<1x128xf32>
    %277 = vector.broadcast %276 : vector<1x128xf32> to vector<16x128xf32>
    %278 = arith.mulf %275, %277 : vector<16x128xf32>
    %c7_i32_151 = arith.constant 7 : i32
    %279 = tpu.dynamic_rotate %270 by %c7_i32_151 dim 1 : vector<16x128xf32>, i32 -> vector<16x128xf32>
    %c2_152 = arith.constant 2 : index
    %c0_153 = arith.constant 0 : index
    %280 = vector.load %arg4[%c2_152, %c0_153] : memref<9x512xf32, #tpu.memory_space<vmem>>, vector<1x128xf32>
    %281 = vector.broadcast %280 : vector<1x128xf32> to vector<16x128xf32>
    %282 = arith.mulf %279, %281 : vector<16x128xf32>
    %c1_i32_154 = arith.constant 1 : i32
    %283 = tpu.dynamic_rotate %270 by %c1_i32_154 dim 1 : vector<16x128xf32>, i32 -> vector<16x128xf32>
    %c3_155 = arith.constant 3 : index
    %c0_156 = arith.constant 0 : index
    %284 = vector.load %arg4[%c3_155, %c0_156] : memref<9x512xf32, #tpu.memory_space<vmem>>, vector<1x128xf32>
    %285 = vector.broadcast %284 : vector<1x128xf32> to vector<16x128xf32>
    %286 = arith.mulf %283, %285 : vector<16x128xf32>
    %c127_i32_157 = arith.constant 127 : i32
    %287 = tpu.dynamic_rotate %270 by %c127_i32_157 dim 1 : vector<16x128xf32>, i32 -> vector<16x128xf32>
    %c5_158 = arith.constant 5 : index
    %c0_159 = arith.constant 0 : index
    %288 = vector.load %arg4[%c5_158, %c0_159] : memref<9x512xf32, #tpu.memory_space<vmem>>, vector<1x128xf32>
    %289 = vector.broadcast %288 : vector<1x128xf32> to vector<16x128xf32>
    %290 = arith.mulf %287, %289 : vector<16x128xf32>
    %c121_i32_160 = arith.constant 121 : i32
    %291 = tpu.dynamic_rotate %270 by %c121_i32_160 dim 1 : vector<16x128xf32>, i32 -> vector<16x128xf32>
    %c6_161 = arith.constant 6 : index
    %c0_162 = arith.constant 0 : index
    %292 = vector.load %arg4[%c6_161, %c0_162] : memref<9x512xf32, #tpu.memory_space<vmem>>, vector<1x128xf32>
    %293 = vector.broadcast %292 : vector<1x128xf32> to vector<16x128xf32>
    %294 = arith.mulf %291, %293 : vector<16x128xf32>
    %c120_i32_163 = arith.constant 120 : i32
    %295 = tpu.dynamic_rotate %270 by %c120_i32_163 dim 1 : vector<16x128xf32>, i32 -> vector<16x128xf32>
    %c7_164 = arith.constant 7 : index
    %c0_165 = arith.constant 0 : index
    %296 = vector.load %arg4[%c7_164, %c0_165] : memref<9x512xf32, #tpu.memory_space<vmem>>, vector<1x128xf32>
    %297 = vector.broadcast %296 : vector<1x128xf32> to vector<16x128xf32>
    %298 = arith.mulf %295, %297 : vector<16x128xf32>
    %c119_i32_166 = arith.constant 119 : i32
    %299 = tpu.dynamic_rotate %270 by %c119_i32_166 dim 1 : vector<16x128xf32>, i32 -> vector<16x128xf32>
    %c8_167 = arith.constant 8 : index
    %c0_168 = arith.constant 0 : index
    %300 = vector.load %arg4[%c8_167, %c0_168] : memref<9x512xf32, #tpu.memory_space<vmem>>, vector<1x128xf32>
    %301 = vector.broadcast %300 : vector<1x128xf32> to vector<16x128xf32>
    %302 = arith.mulf %299, %301 : vector<16x128xf32>
    %303 = tpu.concatenate %274, %278, %282, %286, %270, %290, %294, %298, %302 in 0 : vector<16x128xf32>, vector<16x128xf32>, vector<16x128xf32>, vector<16x128xf32>, vector<16x128xf32>, vector<16x128xf32>, vector<16x128xf32>, vector<16x128xf32>, vector<16x128xf32> -> vector<144x128xf32>
    %cst_169 = arith.constant dense<0.000000e+00> : vector<64x128xf32>
    %304 = tpu.matmul %56, %303, %cst_169 {dimension_numbers = #tpu.dot_dimension_numbers<[1], [0], [0], [1], [0, 0, 1, 1], [], []>} : vector<64x144xf32>, vector<144x128xf32>, vector<64x128xf32> -> vector<64x128xf32>
    %305 = vector.extract_strided_slice %304 {offsets = [0, 0], sizes = [48, 128], strides = [1, 1]} : vector<64x128xf32> to vector<48x128xf32>
    %306 = arith.negf %305 : vector<48x128xf32>
    %307 = math.exp %306 : vector<48x128xf32>
    %cst_170 = arith.constant 1.000000e+00 : f32
    %308 = vector.broadcast %cst_170 : f32 to vector<48x128xf32>
    %309 = arith.addf %308, %307 : vector<48x128xf32>
    %310 = arith.divf %308, %309 : vector<48x128xf32>
    %311 = vector.extract_strided_slice %310 {offsets = [0, 0], sizes = [16, 128], strides = [1, 1]} : vector<48x128xf32> to vector<16x128xf32>
    %312 = vector.extract_strided_slice %310 {offsets = [16, 0], sizes = [16, 128], strides = [1, 1]} : vector<48x128xf32> to vector<16x128xf32>
    %313 = vector.extract_strided_slice %310 {offsets = [32, 0], sizes = [16, 128], strides = [1, 1]} : vector<48x128xf32> to vector<16x128xf32>
    %314 = vector.extract_strided_slice %304 {offsets = [48, 0], sizes = [16, 128], strides = [1, 1]} : vector<64x128xf32> to vector<16x128xf32>
    %cst_171 = arith.constant 0.000000e+00 : f32
    %cst_172 = arith.constant 6.000000e+00 : f32
    %315 = vector.broadcast %cst_171 : f32 to vector<16x128xf32>
    %316 = arith.maximumf %315, %314 : vector<16x128xf32>
    %317 = vector.broadcast %cst_172 : f32 to vector<16x128xf32>
    %318 = arith.minimumf %317, %316 : vector<16x128xf32>
    %319 = arith.mulf %312, %252 : vector<16x128xf32>
    %320 = arith.mulf %311, %318 : vector<16x128xf32>
    %321 = arith.addf %319, %320 : vector<16x128xf32>
    %cst_173 = arith.constant 0.000000e+00 : f32
    %cst_174 = arith.constant 6.000000e+00 : f32
    %322 = vector.broadcast %cst_173 : f32 to vector<16x128xf32>
    %323 = arith.maximumf %322, %321 : vector<16x128xf32>
    %324 = vector.broadcast %cst_174 : f32 to vector<16x128xf32>
    %325 = arith.minimumf %324, %323 : vector<16x128xf32>
    %326 = arith.mulf %313, %325 : vector<16x128xf32>
    %327 = arith.index_cast %c3_i32 : i32 to index
    %c0_175 = arith.constant 0 : index
    %c0_176 = arith.constant 0 : index
    %328 = vector.load %arg9[%327, %c0_175, %c0_176] : memref<4x16x128xf32, #tpu.memory_space<vmem>>, vector<1x16x128xf32>
    %329 = vector.shape_cast %328 : vector<1x16x128xf32> to vector<16x128xf32>
    %330 = vector.shape_cast %326 : vector<16x128xf32> to vector<1x16x128xf32>
    tpu.vector_store %arg9[%327, %c0_175, %c0_176], %330 {strides = array<i32>} : memref<4x16x128xf32, #tpu.memory_space<vmem>>, vector<1x16x128xf32>,
    %331 = arith.index_cast %c3_i32 : i32 to index
    %c0_177 = arith.constant 0 : index
    %c0_178 = arith.constant 0 : index
    %332 = vector.load %arg10[%331, %c0_177, %c0_178] : memref<4x16x128xf32, #tpu.memory_space<vmem>>, vector<1x16x128xf32>
    %333 = vector.shape_cast %332 : vector<1x16x128xf32> to vector<16x128xf32>
    %334 = vector.shape_cast %321 : vector<16x128xf32> to vector<1x16x128xf32>
    tpu.vector_store %arg10[%331, %c0_177, %c0_178], %334 {strides = array<i32>} : memref<4x16x128xf32, #tpu.memory_space<vmem>>, vector<1x16x128xf32>,
    %c4_i32 = arith.constant 4 : i32
    return
  }
  func.func @transform_0(%arg0: i32) -> (i32, i32) {
    %c0_i32 = arith.constant 0 : i32
    %c0_i32_0 = arith.constant 0 : i32
    %c0_i32_1 = arith.constant 0 : i32
    return %c0_i32, %c0_i32_0 : i32, i32
  }
  func.func @transform_1(%arg0: i32) -> (i32, i32) {
    %c0_i32 = arith.constant 0 : i32
    %c0_i32_0 = arith.constant 0 : i32
    %c0_i32_1 = arith.constant 0 : i32
    return %c0_i32, %c0_i32_0 : i32, i32
  }
  func.func @transform_2(%arg0: i32) -> (i32, i32) {
    %c0_i32 = arith.constant 0 : i32
    %c0_i32_0 = arith.constant 0 : i32
    %c0_i32_1 = arith.constant 0 : i32
    return %c0_i32, %c0_i32_0 : i32, i32
  }
  func.func @transform_3(%arg0: i32) -> (i32, i32) {
    %c0_i32 = arith.constant 0 : i32
    %c0_i32_0 = arith.constant 0 : i32
    %c0_i32_1 = arith.constant 0 : i32
    return %c0_i32, %c0_i32_0 : i32, i32
  }
  func.func @transform_4(%arg0: i32) -> (i32, i32) {
    %c0_i32 = arith.constant 0 : i32
    %c0_i32_0 = arith.constant 0 : i32
    %c0_i32_1 = arith.constant 0 : i32
    return %c0_i32, %c0_i32_0 : i32, i32
  }
  func.func @transform_5(%arg0: i32) -> (i32, i32) {
    %c0_i32 = arith.constant 0 : i32
    %c0_i32_0 = arith.constant 0 : i32
    %c0_i32_1 = arith.constant 0 : i32
    return %c0_i32, %c0_i32_0 : i32, i32
  }
  func.func @transform_6(%arg0: i32) -> (i32, i32) {
    %c0_i32 = arith.constant 0 : i32
    %c0_i32_0 = arith.constant 0 : i32
    %c0_i32_1 = arith.constant 0 : i32
    return %c0_i32, %c0_i32_0 : i32, i32
  }
  func.func @transform_7(%arg0: i32) -> (i32, i32) {
    %c0_i32 = arith.constant 0 : i32
    %c0_i32_0 = arith.constant 0 : i32
    %c0_i32_1 = arith.constant 0 : i32
    return %c0_i32, %c0_i32_0 : i32, i32
  }
  func.func @transform_8(%arg0: i32) -> (i32, i32, i32) {
    %c0_i32 = arith.constant 0 : i32
    %c0_i32_0 = arith.constant 0 : i32
    %c0_i32_1 = arith.constant 0 : i32
    %c0_i32_2 = arith.constant 0 : i32
    return %c0_i32, %c0_i32_0, %c0_i32_1 : i32, i32, i32
  }
  func.func @transform_9(%arg0: i32) -> (i32, i32, i32) {
    %c0_i32 = arith.constant 0 : i32
    %c0_i32_0 = arith.constant 0 : i32
    %c0_i32_1 = arith.constant 0 : i32
    %c0_i32_2 = arith.constant 0 : i32
    return %c0_i32, %c0_i32_0, %c0_i32_1 : i32, i32, i32
  }
}

</mosaic_0001>

<bundles_post_ra>
// kernel: bottleneck_lstm.1
= control target key start
LH: loop header
LB: loop body
LE: loop exit
PB: predicated region body
PF: predicated region fallthrough
CT: control target
= control target key end

     0   :  { %s1887_s11 = smov 121   ;;  %s1888_s12 = smov 120   ;;  %v1890_v1 = vmov 0   ;;  %v43_v9 = vlaneseq  ;;  %vm274_vm8 = vcmask 588800   ;;  %vm408_vm9 = vcmask 130048   ;;  %s3218_s0 = inlined_call_operand.vmem [shape: f32[8,512], index: 0, kind: input, shape index: {}]   ;;  %s3219_s5 = inlined_call_operand.vmem [shape: f32[16,1], index: 5, kind: input, shape index: {}]   ;;  %s3220_s3 = inlined_call_operand.vmem [shape: f32[9,512], index: 3, kind: input, shape index: {}]   ;;  %s3221_s4 = inlined_call_operand.vmem [shape: f32[16,72], index: 4, kind: input, shape index: {}]   ;;  %s3222_s1 = inlined_call_operand.vmem [shape: f32[16,128], index: 1, kind: input, shape index: {}]   ;;  %s3223_s6 = inlined_call_operand.vmem [shape: f32[16,16], index: 6, kind: input, shape index: {}]   ;;  %s3224_s7 = inlined_call_operand.vmem [shape: f32[64,144], index: 7, kind: input, shape index: {}]   ;;  %s3225_s2 = inlined_call_operand.vmem [shape: f32[16,128], index: 2, kind: input, shape index: {}]   ;;  %s3226_s9 = inlined_call_operand.vmem [shape: f32[4,16,128], index: 9, kind: output, shape index: {1}]   ;;  %s3227_s8 = inlined_call_operand.vmem [shape: f32[4,16,128], index: 8, kind: output, shape index: {0}]  }
   0x1   :  { %v1949_v0 = vld [vmem:[%s3218_s0] sm:$0xff]  ;;  %s1889_s13 = smov 119   ;;  %1766 = vset.pattern.permute.xlu2 %v1890_v1  ;;  %1765 = vset.pattern.permute.xlu1 %v1890_v1  ;;  %v1960_v2 = vld [vmem:[%s3218_s0 + $0x8] sm:$0xff]  ;;  %s1891_s16 = smov 1   ;;  %v1977_v3 = vld [vmem:[%s3218_s0 + $0x18] sm:$0xff] }
   0x2   :  { %176 = vrot.lane.b32.xlu2 %v1949_v0, %s1887_s11  ;;  %204 = vrot.lane.b32.xlu1 %v1949_v0, %s1888_s12  ;;  %s1892_s17 = smov 127   ;;  %s1893_s20 = smov 7   ;;  %v262_v4 = vld [vmem:[%s3219_s5] sm:$0xff]  ;;  %v263_v5 = vld [vmem:[%s3219_s5 + $0x8] sm:$0xff]  ;;  %v2044_v12 = vand.u32 127, %v43_v9 }
   0x3   :  { %232 = vrot.lane.b32.xlu0 %v1949_v0, %s1889_s13  ;;  %s1894_s21 = smov 9   ;;  %s1895_s22 = smov 8   ;;  %v2002_v6 = vld [vmem:[%s3218_s0 + $0x10] sm:$0xff]  ;;  %v2166_v59 = vld [vmem:[%s3221_s4] sm:$0xff]  ;;  %v403_v60 = vld [vmem:[%s3222_s1 + $0x8] sm:$0xff] }
   0x4   :  { %1767 = vset.pattern.permute.xlu0 %v1890_v1  ;;  %v2049_v13 = vld [vmem:[%s3220_s3 + $0x20] ss:$8 sm:$0xf]  ;;  %v2056_v15 = vld [vmem:[%s3220_s3 + $0x7] ss:$8 sm:$0xf] }
   0x5   :  { %vm212_vm0 = vcmp.lt.s32.totalorder %v2044_v12, 120  ;;  %vm240_vm1 = vcmp.lt.s32.totalorder %v2044_v12, 119  ;;  %v248_v16 = vperm.slane %v2049_v13, 0  ;;  %v2066_v18 = vld [vmem:[%s3220_s3 + $0x6] ss:$8 sm:$0xf] }
   0x6   :  { %vm184_vm2 = vcmp.lt.s32.totalorder %v2044_v12, 121  ;;  %v220_v20 = vperm.slane %v2056_v15, 0  ;;  %v192_v24 = vperm.slane %v2066_v18, 0  ;;  %v2088_v26 = vld [vmem:[%s3220_s3 + $0x5] ss:$8 sm:$0xf] }
   0x7   :  { %vm156_vm3 = vcmp.lt.s32.totalorder %v2044_v12, 127  ;;  %v164_v30 = vperm.slane %v2088_v26, 0  ;;  %v2105_v35 = vld [vmem:[%s3220_s3 + $0x3] ss:$8 sm:$0xf]  ;;  %vm100_vm4 = vcmp.lt.s32.totalorder %v2044_v12, 7 }
   0x8   :  { %v2110_v36 = vld [vmem:[%s3220_s3 + $0x2] ss:$8 sm:$0xf]  ;;  %vm128_vm5 = vcmp.lt.s32.totalorder %v2044_v12, 1  ;;  %v136_v37 = vperm.slane %v2105_v35, 0  ;;  %vm72_vm6 = vcmp.lt.s32.totalorder %v2044_v12, 8 }
   0x9   :  { %v108_v38 = vperm.slane %v2110_v36, 0  ;;  %v2134_v46 = vld [vmem:[%s3220_s3 + $0x1] ss:$8 sm:$0xf]  ;;  %vm45_vm7 = vcmp.lt.s32.totalorder %v2044_v12, 9  ;;  %v251_v62 = vperm.slane %v2049_v13, 3 }
   0xa   :  { %178 = vrot.lane.b32.xlu2 %v1960_v2, %s1887_s11  ;;  %206 = vrot.lane.b32.xlu1 %v1960_v2, %s1888_s12  ;;  %v80_v47 = vperm.slane %v2134_v46, 0  ;;  %v2151_v53 = vld [vmem:[%s3220_s3] ss:$8 sm:$0xf]  ;;  %v221_v9 = vperm.slane %v2056_v15, 1 }
   0xb   :  { %234 = vrot.lane.b32.xlu0 %v1960_v2, %s1889_s13  ;;  %v52_v54 = vperm.slane %v2151_v53, 0  ;;  %v402_v63 = vld [vmem:[%s3222_s1] sm:$0xff] }
  0x12   :  { %120 = vrot.lane.b32.xlu2 %v1949_v0, %s1891_s16  ;;  %150 = vrot.lane.b32.xlu1 %v1960_v2, %s1892_s17 }
  0x13   :  { %148 = vrot.lane.b32.xlu0 %v1949_v0, %s1892_s17 }
  0x1a   :  { %98 = vrot.lane.b32.xlu2 %v1977_v3, %s1893_s20  ;;  %92 = vrot.lane.b32.xlu1 %v1949_v0, %s1893_s20 }
  0x1b   :  { %126 = vrot.lane.b32.xlu0 %v1977_v3, %s1891_s16 }
  0x22   :  { %35 = vrot.lane.b32.xlu2 %v1949_v0, %s1894_s21  ;;  %70 = vrot.lane.b32.xlu1 %v1977_v3, %s1895_s22 }
  0x23   :  { %64 = vrot.lane.b32.xlu0 %v1949_v0, %s1895_s22 }
  0x2a   :  { %266 = vperm.xlu2 %1766, %v262_v4   ;;  %271 = vperm.xlu1 %1765, %v263_v5  }
  0x2b   :  { %41 = vrot.lane.b32.xlu0 %v1977_v3, %s1894_s21 }
  0x32   :  { %208 = vrot.lane.b32.xlu2 %v2002_v6, %s1888_s12  ;;  %238 = vrot.lane.b32.xlu1 %v1977_v3, %s1889_s13 }
  0x33   :  { %236 = vrot.lane.b32.xlu0 %v2002_v6, %s1889_s13 }
  0x3a   :  { %182 = vrot.lane.b32.xlu2 %v1977_v3, %s1887_s11  ;;  %180 = vrot.lane.b32.xlu1 %v2002_v6, %s1887_s11 }
  0x3b   :  { %210 = vrot.lane.b32.xlu0 %v1977_v3, %s1888_s12 }
  0x42   :  { %154 = vrot.lane.b32.xlu1 %v1977_v3, %s1892_s17 }
  0x43   :  { %152 = vrot.lane.b32.xlu0 %v2002_v6, %s1892_s17 }
  0x4a   :  { %124 = vrot.lane.b32.xlu1 %v2002_v6, %s1891_s16 }
  0x4b   :  { %122 = vrot.lane.b32.xlu0 %v1960_v2, %s1891_s16 }
  0x52   :  { %96 = vrot.lane.b32.xlu1 %v2002_v6, %s1893_s20 }
  0x53   :  { %94 = vrot.lane.b32.xlu0 %v1960_v2, %s1893_s20 }
  0x5a   :  { %68 = vrot.lane.b32.xlu1 %v2002_v6, %s1895_s22 }
  0x5b   :  { %66 = vrot.lane.b32.xlu0 %v1960_v2, %s1895_s22 }
  0x5c   :  { %v2036_v7 = vpop.permute.xlu2 %176 }
  0x62   :  { %39 = vrot.lane.b32.xlu1 %v2002_v6, %s1894_s21 }
  0x63   :  { %37 = vrot.lane.b32.xlu0 %v1960_v2, %s1894_s21 }
  0x64   :  { %v2038_v8 = vpop.permute.xlu2 %178 }
  0x65   :  { %v187_v25 = vsel %vm184_vm2, %v2036_v7, %v2038_v8 }
  0x66   :  { %v200_v29 = vmul.f32 %v192_v24, %v187_v25 }
  0x6c   :  { %v2051_v14 = vpop.permute.xlu2 %120 }
  0x74   :  { %v2040_v10 = vpop.permute.xlu1 %204  ;;  %v2090_v28 = vpop.permute.xlu2 %98 }
  0x75   :  { %v2042_v11 = vpop.permute.xlu0 %232 }
  0x7c   :  { %v2061_v17 = vpop.permute.xlu1 %206  ;;  %v2119_v40 = vpop.permute.xlu2 %35 }
  0x7d   :  { %v2069_v19 = vpop.permute.xlu0 %234  ;;  %v215_v21 = vsel %vm212_vm0, %v2040_v10, %v2061_v17 }
  0x7e   :  { %v243_v22 = vsel %vm240_vm1, %v2042_v11, %v2069_v19  ;;  %v228_v27 = vmul.f32 %v220_v20, %v215_v21 }
  0x7f   :  { %v256_v23 = vmul.f32 %v248_v16, %v243_v22  ;;  %v250_v16 = vperm.slane %v2049_v13, 2 }
  0x81   :  { %288 = vmatpush.msra.mxu0 %v256_v23 }
  0x83   :  { %289 = vmatpush.msra.mxu0 %v228_v27  ;;  %v223_v27 = vperm.slane %v2056_v15, 3 }
  0x84   :  { %v2094_v31 = vpop.permute.xlu1 %150  ;;  %v2146_v51 = vpop.permute.xlu2 %266 }
  0x85   :  { %290 = vmatpush.msra.mxu0 %v200_v29  ;;  %v2096_v32 = vpop.permute.xlu0 %148  ;;  %v222_v29 = vperm.slane %v2056_v15, 2 }
  0x86   :  { %v159_v33 = vsel %vm156_vm3, %v2096_v32, %v2094_v31 }
  0x87   :  { %v172_v34 = vmul.f32 %v164_v30, %v159_v33  ;;  %v194_v30 = vperm.slane %v2066_v18, 2 }
  0x89   :  { %291 = vmatpush.msra.mxu0 %v172_v34 }
  0x8b   :  { %292 = vmatpush.msra.mxu0 %v1949_v0  ;;  %v249_v0 = vperm.slane %v2049_v13, 1 }
  0x8c   :  { %v2117_v39 = vpop.permute.xlu1 %92  ;;  %v209_v61 = vpop.permute.xlu2 %208 }
  0x8d   :  { %v104_v41 = vsel %vm100_vm4, %v2090_v28, %v2117_v39  ;;  %v2125_v42 = vpop.permute.xlu0 %126  ;;  %v214_v20 = vsel %vm212_vm0, %v2061_v17, %v209_v61  ;;  %v193_v17 = vperm.slane %v2066_v18, 1 }
  0x8e   :  { %v132_v43 = vsel %vm128_vm5, %v2125_v42, %v2051_v14  ;;  %v116_v45 = vmul.f32 %v108_v38, %v104_v41  ;;  %v229_v13 = vmul.f32 %v221_v9, %v214_v20  ;;  %v195_v41 = vperm.slane %v2066_v18, 3 }
  0x8f   :  { %v144_v44 = vmul.f32 %v136_v37, %v132_v43 }
  0x91   :  { %293 = vmatpush.msra.mxu0 %v144_v44 }
  0x93   :  { %294 = vmatpush.msra.mxu0 %v116_v45 }
  0x94   :  { %v2138_v48 = vpop.permute.xlu1 %70 }
  0x95   :  { %v2140_v49 = vpop.permute.xlu0 %64 }
  0x96   :  { %v76_v50 = vsel %vm72_vm6, %v2138_v48, %v2140_v49 }
  0x97   :  { %v88_v52 = vmul.f32 %v80_v47, %v76_v50 }
  0x99   :  { %295 = vmatpush.msra.mxu0 %v88_v52  ;;  %v167_v52 = vperm.slane %v2088_v26, 3 }
  0x9c   :  { %v2155_v55 = vpop.permute.xlu1 %271 }
  0x9d   :  { %v2157_v56 = vpop.permute.xlu0 %41 }
  0x9e   :  { %v49_v57 = vsel %vm45_vm7, %v2157_v56, %v2119_v40 }
  0x9f   :  { %v60_v58 = vmul.f32 %v52_v54, %v49_v57  ;;  %v166_v54 = vperm.slane %v2088_v26, 2 }
  0xa1   :  { %296 = vmatpush.msra.mxu0 %v60_v58 }
  0xa2   :  { %1654 = vmatmul.msk.f32.vlgmr.msra.gmra.mxu0 %vm274_vm8, %v2166_v59 }
  0xa3   :  { %429 = vmatpush.msrb.mxu0 %v403_v60 }
  0xa4   :  { %v239_v1 = vpop.permute.xlu1 %238 }
  0xa5   :  { %v237_v4 = vpop.permute.xlu0 %236  ;;  %v244_v5 = vsel %vm240_vm1, %v239_v1, %v2042_v11  ;;  %430 = vmatpush.msrb.mxu0 %v402_v63  ;;  %v2194_v11 = vld [vmem:[%s3221_s4 + $0x8] sm:$0xff] }
  0xa6   :  { %v242_v21 = vsel %vm240_vm1, %v2069_v19, %v237_v4  ;;  %v259_v22 = vmul.f32 %v251_v62, %v244_v5  ;;  %v241_v23 = vsel %vm240_vm1, %v237_v4, %v239_v1  ;;  %v183_v19 = vpop.permute.xlu2 %182  ;;  %v2237_v1 = vld [vmem:[%s3223_s6 + $0x8] sm:$0xff]  ;;  %v138_v4 = vperm.slane %v2105_v35, 2 }
  0xa7   :  { %v257_v24 = vmul.f32 %v249_v0, %v242_v21  ;;  %v258_v25 = vmul.f32 %v250_v16, %v241_v23  ;;  %v188_v43 = vsel %vm184_vm2, %v183_v19, %v2036_v7 }
  0xa8   :  { %357 = vmatpush.msra.mxu3 %v259_v22  ;;  %v203_v7 = vmul.f32 %v195_v41, %v188_v43 }
  0xa9   :  { %311 = vmatpush.msra.mxu1 %v257_v24  ;;  %334 = vmatpush.msra.mxu2 %v258_v25 }
  0xaa   :  { %1655 = vmatmul.msk.f32.gmra.mxu0 %vm274_vm8, %v2194_v11 }
  0xab   :  { %312 = vmatpush.msra.mxu1 %v229_v13 }
  0xac   :  { %v181_v33 = vpop.permute.xlu1 %180 }
  0xad   :  { %v185_v34 = vsel %vm184_vm2, %v181_v33, %v183_v19  ;;  %v186_v37 = vsel %vm184_vm2, %v2038_v8, %v181_v33  ;;  %v211_v38 = vpop.permute.xlu0 %210  ;;  %v2219_v8 = vld [vmem:[%s3223_s6] sm:$0xff] }
  0xae   :  { %v213_v15 = vsel %vm212_vm0, %v209_v61, %v211_v38  ;;  %v216_v44 = vsel %vm212_vm0, %v211_v38, %v2040_v10  ;;  %v201_v45 = vmul.f32 %v193_v17, %v186_v37  ;;  %v202_v50 = vmul.f32 %v194_v30, %v185_v34 }
  0xaf   :  { %v231_v47 = vmul.f32 %v223_v27, %v216_v44  ;;  %v230_v18 = vmul.f32 %v222_v29, %v213_v15  ;;  %v165_v10 = vperm.slane %v2088_v26, 1  ;;  %v81_v29 = vperm.slane %v2134_v46, 1 }
  0xb0   :  { %313 = vmatpush.msra.mxu1 %v201_v45  ;;  %v53_v15 = vperm.slane %v2151_v53, 1 }
  0xb1   :  { %358 = vmatpush.msra.mxu3 %v231_v47  ;;  %335 = vmatpush.msra.mxu2 %v230_v18 }
  0xb2   :  { %1662 = vmatmul.msk.f32.vlgmr.msrb.gmra.mxu0 %vm408_vm9, %v2219_v8 }
  0xb3   :  { %359 = vmatpush.msra.mxu3 %v203_v7  ;;  %336 = vmatpush.msra.mxu2 %v202_v50 }
  0xb4   :  { %v155_v57 = vpop.permute.xlu1 %154 }
  0xb5   :  { %v160_v58 = vsel %vm156_vm3, %v155_v57, %v2096_v32  ;;  %v153_v60 = vpop.permute.xlu0 %152  ;;  %v139_v32 = vperm.slane %v2105_v35, 3 }
  0xb6   :  { %v157_v61 = vsel %vm156_vm3, %v153_v60, %v155_v57  ;;  %v158_v62 = vsel %vm156_vm3, %v2094_v31, %v153_v60  ;;  %v175_v63 = vmul.f32 %v167_v52, %v160_v58  ;;  %v137_v31 = vperm.slane %v2105_v35, 1  ;;  %v2321_v60 = vld [vmem:[%s3220_s3 + $0x7] ss:$0 sm:$0xff] }
  0xb7   :  { %v173_v0 = vmul.f32 %v165_v10, %v158_v62  ;;  %v174_v26 = vmul.f32 %v166_v54, %v157_v61  ;;  %v109_v35 = vperm.slane %v2110_v36, 1 }
  0xb8   :  { %360 = vmatpush.msra.mxu3 %v175_v63 }
  0xb9   :  { %314 = vmatpush.msra.mxu1 %v173_v0  ;;  %337 = vmatpush.msra.mxu2 %v174_v26  ;;  %v2328_v0 = vld [vmem:[%s3220_s3 + $0x6] ss:$0 sm:$0xff] }
  0xba   :  { %1663 = vmatmul.msk.f32.gmra.mxu0 %vm408_vm9, %v2237_v1  ;;  %361 = vmatpush.msra.mxu3 %v1977_v3 }
  0xbb   :  { %315 = vmatpush.msra.mxu1 %v1960_v2  ;;  %338 = vmatpush.msra.mxu2 %v2002_v6  ;;  %v111_v6 = vperm.slane %v2110_v36, 3 }
  0xbc   :  { %v125_v5 = vpop.permute.xlu1 %124 }
  0xbd   :  { %v129_v9 = vsel %vm128_vm5, %v125_v5, %v2125_v42  ;;  %v123_v16 = vpop.permute.xlu0 %122  ;;  %v110_v42 = vperm.slane %v2110_v36, 2  ;;  %v83_v36 = vperm.slane %v2134_v46, 3 }
  0xbe   :  { %v130_v20 = vsel %vm128_vm5, %v123_v16, %v125_v5  ;;  %v131_v3 = vsel %vm128_vm5, %v2051_v14, %v123_v16  ;;  %v147_v2 = vmul.f32 %v139_v32, %v129_v9  ;;  %v2335_v9 = vld [vmem:[%s3220_s3 + $0x5] ss:$0 sm:$0xff] }
  0xbf   :  { %v145_v21 = vmul.f32 %v137_v31, %v131_v3  ;;  %v146_v22 = vmul.f32 %v138_v4, %v130_v20 }
  0xc0   :  { %362 = vmatpush.msra.mxu3 %v147_v2 }
  0xc1   :  { %316 = vmatpush.msra.mxu1 %v145_v21  ;;  %339 = vmatpush.msra.mxu2 %v146_v22  ;;  %v2342_v21 = vld [vmem:[%s3220_s3 + $0x3] ss:$0 sm:$0xff] }
  0xc4   :  { %v97_v23 = vpop.permute.xlu1 %96 }
  0xc5   :  { %v101_v24 = vsel %vm100_vm4, %v97_v23, %v2090_v28  ;;  %v95_v25 = vpop.permute.xlu0 %94  ;;  %v82_v28 = vperm.slane %v2134_v46, 2  ;;  %v55_v46 = vperm.slane %v2151_v53, 3 }
  0xc6   :  { %v102_v14 = vsel %vm100_vm4, %v95_v25, %v97_v23  ;;  %v103_v13 = vsel %vm100_vm4, %v2117_v39, %v95_v25  ;;  %v119_v17 = vmul.f32 %v111_v6, %v101_v24  ;;  %v2349_v23 = vld [vmem:[%s3220_s3 + $0x2] ss:$0 sm:$0xff]  ;;  %v2355_v25 = vld [vmem:[%s3220_s3 + $0x1] ss:$0 sm:$0xff] }
  0xc7   :  { %v117_v19 = vmul.f32 %v109_v35, %v103_v13  ;;  %v118_v27 = vmul.f32 %v110_v42, %v102_v14 }
  0xc8   :  { %363 = vmatpush.msra.mxu3 %v119_v17  ;;  %v2361_v17 = vld [vmem:[%s3220_s3 + $0x20] ss:$0 sm:$0xff] }
  0xc9   :  { %317 = vmatpush.msra.mxu1 %v117_v19  ;;  %340 = vmatpush.msra.mxu2 %v118_v27 }
  0xcc   :  { %v69_v30 = vpop.permute.xlu1 %68 }
  0xcd   :  { %v73_v33 = vsel %vm72_vm6, %v69_v30, %v2138_v48  ;;  %v67_v34 = vpop.permute.xlu0 %66  ;;  %v54_v48 = vperm.slane %v2151_v53, 2 }
  0xce   :  { %v74_v39 = vsel %vm72_vm6, %v67_v34, %v69_v30  ;;  %v75_v37 = vsel %vm72_vm6, %v2140_v49, %v67_v34  ;;  %v91_v38 = vmul.f32 %v83_v36, %v73_v33  ;;  %v2369_v30 = vld [vmem:[%s3224_s7 + $0x8] sm:$0xff]  ;;  %v2376_v33 = vld [vmem:[%s3220_s3] ss:$0 sm:$0xff] }
  0xcf   :  { %v89_v41 = vmul.f32 %v81_v29, %v75_v37  ;;  %v90_v43 = vmul.f32 %v82_v28, %v74_v39 }
  0xd0   :  { %364 = vmatpush.msra.mxu3 %v91_v38 }
  0xd1   :  { %318 = vmatpush.msra.mxu1 %v89_v41  ;;  %341 = vmatpush.msra.mxu2 %v90_v43  ;;  %v2383_v43 = vld [vmem:[%s3224_s7 + $0x18] sm:$0xff] }
  0xd4   :  { %v40_v44 = vpop.permute.xlu1 %39 }
  0xd5   :  { %v46_v45 = vsel %vm45_vm7, %v40_v44, %v2157_v56  ;;  %v38_v47 = vpop.permute.xlu0 %37 }
  0xd6   :  { %v47_v49 = vsel %vm45_vm7, %v38_v47, %v40_v44  ;;  %v48_v18 = vsel %vm45_vm7, %v2119_v40, %v38_v47  ;;  %v63_v50 = vmul.f32 %v55_v46, %v46_v45  ;;  %v2402_v44 = vld [vmem:[%s3224_s7 + $0x10] sm:$0xff]  ;;  %v2410_v45 = vld [vmem:[%s3224_s7 + $0x38] sm:$0xff]  ;;  %v2415_v47 = vld [vmem:[%s3224_s7 + $0x20] sm:$0xff] }
  0xd7   :  { %v61_v7 = vmul.f32 %v53_v15, %v48_v18  ;;  %v62_v52 = vmul.f32 %v54_v48, %v47_v49  ;;  %v2389_v15 = vld [vmem:[%s3224_s7] sm:$0xff]  ;;  %v2397_v48 = vld [vmem:[%s3224_s7 + $0x28] sm:$0xff]  ;;  %v2428_v18 = vld [vmem:[%s3224_s7 + $0x30] sm:$0xff] }
  0xd8   :  { %365 = vmatpush.msra.mxu3 %v63_v50  ;;  %v2423_v49 = vld [vmem:[%s3224_s7 + $0x48] sm:$0xff]  ;;  %v2436_v50 = vld [vmem:[%s3224_s7 + $0x58] sm:$0xff] }
  0xd9   :  { %319 = vmatpush.msra.mxu1 %v61_v7  ;;  %342 = vmatpush.msra.mxu2 %v62_v52  ;;  %v2441_v7 = vld [vmem:[%s3224_s7 + $0x40] sm:$0xff]  ;;  %v2449_v52 = vld [vmem:[%s3224_s7 + $0x68] sm:$0xff] }
  0xda   :  { %1656 = vmatmul.msk.f32.vlgmr.msra.gmra.mxu1 %vm274_vm8, %v2166_v59  ;;  %1658 = vmatmul.msk.f32.vlgmr.msra.gmra.mxu2 %vm274_vm8, %v2166_v59 }
  0xdb   :  { %1660 = vmatmul.msk.f32.vlgmr.msra.gmra.mxu3 %vm274_vm8, %v2166_v59 }
  0xe2   :  { %1657 = vmatmul.msk.f32.gmra.mxu1 %vm274_vm8, %v2194_v11  ;;  %1659 = vmatmul.msk.f32.gmra.mxu2 %vm274_vm8, %v2194_v11 }
  0xe3   :  { %1661 = vmatmul.msk.f32.gmra.mxu3 %vm274_vm8, %v2194_v11 }
 0x11f   :  { %v298_v12 = vpop.f32.mrf.mxu0 }
 0x120   :  { %v299_v53 = vadd.f32 %v298_v12, %v2146_v51  ;;  %v2454_v12 = vld [vmem:[%s3224_s7 + $0x50] sm:$0xff] }
 0x127   :  { %v301_v40 = vpop.f32.mrf.mxu0 }
 0x128   :  { %v302_v59 = vadd.f32 %v301_v40, %v2155_v55  ;;  %v2462_v40 = vld [vmem:[%s3224_s7 + $0x78] sm:$0xff] }
 0x12f   :  { %v432_v56 = vpop.f32.mrf.mxu0 }
 0x130   :  { %v438_v10 = vadd.f32 %v432_v56, %v299_v53  ;;  %v2467_v53 = vld [vmem:[%s3224_s7 + $0x60] sm:$0xff]  ;;  %v2475_v56 = vld [vmem:[%s3224_s7 + $0x70] sm:$0xff] }
 0x132   :  { %454 = vrot.lane.b32.xlu1 %v438_v10, %s1893_s20  ;;  %468 = vrot.lane.b32.xlu0 %v438_v10, %s1892_s17 }
 0x133   :  { %482 = vrot.lane.b32.xlu2 %v438_v10, %s1888_s12 }
 0x137   :  { %v435_v54 = vpop.f32.mrf.mxu0 }
 0x138   :  { %v439_v57 = vadd.f32 %v435_v54, %v302_v59 }
 0x13a   :  { %463 = vrot.lane.b32.xlu1 %v439_v57, %s1891_s16  ;;  %456 = vrot.lane.b32.xlu0 %v439_v57, %s1893_s20 }
 0x13b   :  { %475 = vrot.lane.b32.xlu2 %v438_v10, %s1887_s11 }
 0x142   :  { %489 = vrot.lane.b32.xlu1 %v438_v10, %s1889_s13  ;;  %449 = vrot.lane.b32.xlu0 %v439_v57, %s1895_s22 }
 0x143   :  { %484 = vrot.lane.b32.xlu2 %v439_v57, %s1888_s12 }
 0x14a   :  { %440 = vrot.lane.b32.xlu1 %v438_v10, %s1894_s21  ;;  %442 = vrot.lane.b32.xlu0 %v439_v57, %s1894_s21 }
 0x14b   :  { %477 = vrot.lane.b32.xlu2 %v439_v57, %s1887_s11 }
 0x153   :  { %470 = vrot.lane.b32.xlu2 %v439_v57, %s1892_s17 }
 0x157   :  { %v2480_v59 = vpop.f32.mrf.mxu1 }
 0x15b   :  { %461 = vrot.lane.b32.xlu2 %v438_v10, %s1891_s16 }
 0x163   :  { %491 = vrot.lane.b32.xlu2 %v439_v57, %s1889_s13 }
 0x16b   :  { %447 = vrot.lane.b32.xlu2 %v438_v10, %s1895_s22 }
 0x18d   :  { %v483_v11 = vpop.permute.xlu2 %482 }
 0x18e   :  { %v487_v63 = vmul.f32 %v2321_v60, %v483_v11 }
 0x195   :  { %v476_v58 = vpop.permute.xlu2 %475 }
 0x196   :  { %v480_v4 = vmul.f32 %v2328_v0, %v476_v58 }
 0x19d   :  { %v485_v61 = vpop.permute.xlu2 %484 }
 0x19e   :  { %v488_v62 = vmul.f32 %v2321_v60, %v485_v61 }
 0x1a0   :  { %520 = vmatpush.msrb.mxu1 %v488_v62 }
 0x1a2   :  { %521 = vmatpush.msrb.mxu1 %v487_v63 }
 0x1a4   :  { %v469_v31 = vpop.permute.xlu0 %468  ;;  %v455_v5 = vpop.permute.xlu1 %454 }
 0x1a5   :  { %v478_v26 = vpop.permute.xlu2 %477  ;;  %v473_v3 = vmul.f32 %v2335_v9, %v469_v31  ;;  %v459_v13 = vmul.f32 %v2349_v23, %v455_v5 }
 0x1a6   :  { %v481_v32 = vmul.f32 %v2328_v0, %v478_v26 }
 0x1a8   :  { %522 = vmatpush.msrb.mxu1 %v481_v32 }
 0x1aa   :  { %523 = vmatpush.msrb.mxu1 %v480_v4 }
 0x1ac   :  { %v457_v2 = vpop.permute.xlu0 %456  ;;  %v464_v22 = vpop.permute.xlu1 %463 }
 0x1ad   :  { %v471_v16 = vpop.permute.xlu2 %470  ;;  %v467_v35 = vmul.f32 %v2342_v21, %v464_v22  ;;  %v460_v24 = vmul.f32 %v2349_v23, %v457_v2 }
 0x1ae   :  { %v474_v20 = vmul.f32 %v2335_v9, %v471_v16 }
 0x1b0   :  { %524 = vmatpush.msrb.mxu1 %v474_v20 }
 0x1b2   :  { %525 = vmatpush.msrb.mxu1 %v473_v3 }
 0x1b4   :  { %526 = vmatpush.msrb.mxu1 %v439_v57  ;;  %v450_v14 = vpop.permute.xlu0 %449  ;;  %v490_v19 = vpop.permute.xlu1 %489 }
 0x1b5   :  { %v462_v6 = vpop.permute.xlu2 %461  ;;  %v453_v36 = vmul.f32 %v2355_v25, %v450_v14  ;;  %v494_v28 = vmul.f32 %v2361_v17, %v490_v19  ;;  %v2484_v57 = vpop.f32.mrf.mxu1 }
 0x1b6   :  { %527 = vmatpush.msrb.mxu1 %v438_v10  ;;  %v466_v42 = vmul.f32 %v2342_v21, %v462_v6  ;;  %v2478_v10 = vpop.f32.mrf.mxu2 }
 0x1b8   :  { %528 = vmatpush.msrb.mxu1 %v467_v35 }
 0x1ba   :  { %529 = vmatpush.msrb.mxu1 %v466_v42 }
 0x1bc   :  { %530 = vmatpush.msrb.mxu1 %v460_v24  ;;  %v443_v34 = vpop.permute.xlu0 %442  ;;  %v441_v38 = vpop.permute.xlu1 %440 }
 0x1bd   :  { %v492_v27 = vpop.permute.xlu2 %491  ;;  %v446_v41 = vmul.f32 %v2376_v33, %v443_v34  ;;  %v445_v46 = vmul.f32 %v2376_v33, %v441_v38 }
 0x1be   :  { %v495_v29 = vmul.f32 %v2361_v17, %v492_v27  ;;  %531 = vmatpush.msrb.mxu1 %v459_v13  ;;  %v2482_v54 = vpop.f32.mrf.mxu2 }
 0x1c0   :  { %532 = vmatpush.msrb.mxu1 %v453_v36  ;;  %575 = vmatpush.msrb.mxu2 %v495_v29 }
 0x1c2   :  { %576 = vmatpush.msrb.mxu2 %v494_v28 }
 0x1c3   :  { %1664 = vmatmul.msk.f32.vlgmr.msrb.gmra.mxu2 %vm408_vm9, %v2369_v30 }
 0x1c5   :  { %v448_v39 = vpop.permute.xlu2 %447 }
 0x1c6   :  { %v452_v37 = vmul.f32 %v2355_v25, %v448_v39 }
 0x1c8   :  { %533 = vmatpush.msrb.mxu1 %v452_v37 }
 0x1ca   :  { %534 = vmatpush.msrb.mxu1 %v446_v41 }
 0x1cb   :  { %1665 = vmatmul.msk.f32.gmra.mxu2 %vm408_vm9, %v2383_v43 }
 0x1cc   :  { %535 = vmatpush.msrb.mxu1 %v445_v46 }
 0x1cd   :  { %536 = vmatmul.f32.vlgmr.msrb.gmra.mxu1 %v2389_v15 }
 0x1d3   :  { %1666 = vmatmul.msk.f32.gmra.mxu2 %vm408_vm9, %v2397_v48 }
 0x1d5   :  { %539 = vmatmul.f32.gmra.mxu1 %v2402_v44 }
 0x1db   :  { %1667 = vmatmul.msk.f32.gmra.mxu2 %vm408_vm9, %v2410_v45 }
 0x1dd   :  { %542 = vmatmul.f32.gmra.mxu1 %v2415_v47 }
 0x1e3   :  { %1668 = vmatmul.msk.f32.gmra.mxu2 %vm408_vm9, %v2423_v49 }
 0x1e5   :  { %545 = vmatmul.f32.gmra.mxu1 %v2428_v18 }
 0x1eb   :  { %1669 = vmatmul.msk.f32.gmra.mxu2 %vm408_vm9, %v2436_v50 }
 0x1ed   :  { %548 = vmatmul.f32.gmra.mxu1 %v2441_v7 }
 0x1f3   :  { %1670 = vmatmul.msk.f32.gmra.mxu2 %vm408_vm9, %v2449_v52 }
 0x1f5   :  { %551 = vmatmul.f32.gmra.mxu1 %v2454_v12 }
 0x1fb   :  { %1671 = vmatmul.msk.f32.gmra.mxu2 %vm408_vm9, %v2462_v40 }
 0x1fd   :  { %554 = vmatmul.f32.gmra.mxu1 %v2467_v53 }
 0x205   :  { %557 = vmatmul.f32.gmra.mxu1 %v2475_v56 }
 0x246   :  { %v578_v11 = vpop.f32.mrf.mxu2 }
 0x24a   :  { %v537_v58 = vpop.f32.mrf.mxu1 }
 0x24b   :  { %v579_v61 = vadd.f32 %v578_v11, %v537_v58 }
 0x24d   :  { %v1672_v63 = vmul.f32 -1.442695, %v579_v61 }
 0x24e   :  { %v581_v62 = vpop.f32.mrf.mxu2 }
 0x24f   :  { %1768 = vpow2.f32 %v1672_v63 }
 0x252   :  { %v540_v26 = vpop.f32.mrf.mxu1 }
 0x253   :  { %v582_v32 = vadd.f32 %v581_v62, %v540_v26 }
 0x255   :  { %v1673_v4 = vmul.f32 -1.442695, %v582_v32  ;;  %v1769_v20 = vpop.eup %1768 }
 0x256   :  { %v584_v31 = vpop.f32.mrf.mxu2  ;;  %v2486_v22 = vadd.f32 1.0, %v1769_v20 }
 0x257   :  { %1770 = vpow2.f32 %v1673_v4 }
 0x258   :  { %vm631_vm13 = vweird.f32 %v2486_v22 }
 0x25a   :  { %v543_v5 = vpop.f32.mrf.mxu1 }
 0x25b   :  { %v585_v16 = vadd.f32 %v584_v31, %v543_v5 }
 0x25d   :  { %v1674_v3 = vmul.f32 -1.442695, %v585_v16  ;;  %v1771_v6 = vpop.eup %1770 }
 0x25e   :  { %v587_v2 = vpop.f32.mrf.mxu2  ;;  %v2489_v14 = vadd.f32 1.0, %v1771_v6  ;;  %v635_v6 = vand.u32 2147483647, %v2486_v22 }
 0x25f   :  { %1772 = vpow2.f32 %v1674_v3 }
 0x260   :  { %1774 = vrcp.f32 %v2486_v22  ;;  %vm636_vm0 = vcmp.eq.f32.partialorder %v635_v6, 8.507059e+37  ;;  %vm646_vm2 = vweird.f32 %v2489_v14 }
 0x262   :  { %v546_v35 = vpop.f32.mrf.mxu1 }
 0x263   :  { %v588_v42 = vadd.f32 %v587_v2, %v546_v35  ;;  %v637_v35 = vand.u32 2147483648, %v2486_v22 }
 0x265   :  { %v1773_v24 = vpop.eup %1772  ;;  %v1675_v13 = vmul.f32 -1.442695, %v588_v42 }
 0x266   :  { %v622_v19 = vadd.f32 1.0, %v1773_v24  ;;  %v590_v27 = vpop.f32.mrf.mxu2  ;;  %v2491_v36 = vpop.eup %1774 }
 0x267   :  { %1776 = vpow2.f32 %v1675_v13  ;;  %v627_v34 = vmul.f32 %v2491_v36, %v2486_v22  ;;  %vm632_vm11 = vweird.f32 %v2491_v36 }
 0x268   :  { %1778 = vrcp.f32 %v622_v19  ;;  %vm661_vm12 = vweird.f32 %v622_v19  ;;  %vm2520_vm15 = vmor %vm631_vm13, %vm632_vm11 }
 0x269   :  { %1780 = vrcp.f32 %v2489_v14  ;;  %v628_v61 = vsub.f32 1.0, %v627_v34  ;;  %v665_v34 = vand.u32 2147483647, %v622_v19 }
 0x26a   :  { %v549_v29 = vpop.f32.mrf.mxu1 }
 0x26b   :  { %v591_v28 = vadd.f32 %v590_v27, %v549_v29  ;;  %v629_v4 = vmul.f32 %v2491_v36, %v628_v61  ;;  %v667_v29 = vand.u32 2147483648, %v622_v19  ;;  %vm666_vm1 = vcmp.eq.f32.partialorder %v665_v34, 8.507059e+37 }
 0x26c   :  { %v650_v34 = vand.u32 2147483647, %v2489_v14 }
 0x26d   :  { %v1777_v39 = vpop.eup %1776  ;;  %v1676_v37 = vmul.f32 -1.442695, %v591_v28  ;;  %v630_v27 = vadd.f32 %v2491_v36, %v629_v4 }
 0x26e   :  { %v1779_v38 = vpop.eup %1778  ;;  %v2496_v41 = vadd.f32 1.0, %v1777_v39  ;;  %v593_v46 = vpop.f32.mrf.mxu2 }
 0x26f   :  { %v2498_v11 = vpop.eup %1780  ;;  %v657_v58 = vmul.f32 %v1779_v38, %v622_v19  ;;  %1782 = vpow2.f32 %v1676_v37  ;;  %vm662_vm10 = vweird.f32 %v1779_v38  ;;  %v634_v22 = vsel %vm2520_vm15, %v2491_v36, %v630_v27 }
 0x270   :  { %1784 = vrcp.f32 %v2496_v41  ;;  %v642_v26 = vmul.f32 %v2498_v11, %v2489_v14  ;;  %vm2516_vm14 = vmor %vm661_vm12, %vm662_vm10  ;;  %v638_v19 = vor.u32 1.1754944e-38, %v637_v35  ;;  %vm647_vm3 = vweird.f32 %v2498_v11 }
 0x271   :  { %v658_v62 = vsub.f32 1.0, %v657_v58  ;;  %vm676_vm5 = vweird.f32 %v2496_v41  ;;  %v682_v27 = vand.u32 2147483648, %v2496_v41  ;;  %v652_v58 = vand.u32 2147483648, %v2489_v14  ;;  %vm2563_vm7 = vmor %vm646_vm2, %vm647_vm3 }
 0x272   :  { %v552_v63 = vpop.f32.mrf.mxu1  ;;  %v643_v42 = vsub.f32 1.0, %v642_v26  ;;  %v668_v26 = vor.u32 1.1754944e-38, %v667_v29  ;;  %v639_v6 = vsel %vm636_vm0, %v638_v19, %v634_v22  ;;  %vm651_vm12 = vcmp.eq.f32.partialorder %v650_v34, 8.507059e+37 }
 0x273   :  { %v594_v32 = vadd.f32 %v593_v46, %v552_v63  ;;  %v659_v31 = vmul.f32 %v1779_v38, %v658_v62 }
 0x274   :  { %v644_v62 = vmul.f32 %v2498_v11, %v643_v42 }
 0x275   :  { %v1783_v5 = vpop.eup %1782  ;;  %v1677_v16 = vmul.f32 -1.442695, %v594_v32  ;;  %v660_v13 = vadd.f32 %v1779_v38, %v659_v31 }
 0x276   :  { %v2504_v20 = vpop.eup %1784  ;;  %v2506_v3 = vadd.f32 1.0, %v1783_v5  ;;  %v596_v2 = vpop.f32.mrf.mxu2  ;;  %v404_v5 = vld [vmem:[%s3225_s2] sm:$0xff]  ;;  %v645_v42 = vadd.f32 %v2498_v11, %v644_v62 }
 0x277   :  { %v672_v24 = vmul.f32 %v2504_v20, %v2496_v41  ;;  %1786 = vpow2.f32 %v1677_v16  ;;  %v664_v61 = vsel %vm2516_vm14, %v1779_v38, %v660_v13  ;;  %vm677_vm4 = vweird.f32 %v2504_v20 }
 0x278   :  { %1788 = vrcp.f32 %v2506_v3  ;;  %v669_v16 = vsel %vm666_vm1, %v668_v26, %v664_v61  ;;  %v680_v13 = vand.u32 2147483647, %v2496_v41  ;;  %vm2547_vm6 = vmor %vm676_vm5, %vm677_vm4  ;;  %v695_v62 = vand.u32 2147483647, %v2506_v3 }
 0x279   :  { %v673_v28 = vsub.f32 1.0, %v672_v24  ;;  %v720_v29 = vmul.f32 %v669_v16, %v404_v5  ;;  %v697_v41 = vand.u32 2147483648, %v2506_v3  ;;  %vm691_vm11 = vweird.f32 %v2506_v3 }
 0x27a   :  { %v555_v39 = vpop.f32.mrf.mxu1  ;;  %vm681_vm10 = vcmp.eq.f32.partialorder %v680_v13, 8.507059e+37  ;;  %vm696_vm14 = vcmp.eq.f32.partialorder %v695_v62, 8.507059e+37 }
 0x27b   :  { %v597_v46 = vadd.f32 %v596_v2, %v555_v39  ;;  %v674_v63 = vmul.f32 %v2504_v20, %v673_v28 }
 0x27d   :  { %v1787_v32 = vpop.eup %1786  ;;  %v716_v31 = vmax.f32 %v597_v46, 0.0  ;;  %v675_v36 = vadd.f32 %v2504_v20, %v674_v63 }
 0x27e   :  { %v1789_v4 = vpop.eup %1788  ;;  %v2533_v38 = vadd.f32 1.0, %v1787_v32  ;;  %v599_v24 = vpop.f32.mrf.mxu2  ;;  %v683_v32 = vor.u32 1.1754944e-38, %v682_v27 }
 0x27f   :  { %v687_v2 = vmul.f32 %v1789_v4, %v2506_v3  ;;  %v718_v35 = vmin.f32 %v716_v31, 6.0  ;;  %v679_v61 = vsel %vm2547_vm6, %v2504_v20, %v675_v36  ;;  %vm692_vm8 = vweird.f32 %v1789_v4  ;;  %v405_v36 = vld [vmem:[%s3225_s2 + $0x8] sm:$0xff] }
 0x280   :  { %1790 = vrcp.f32 %v2533_v38  ;;  %v649_v20 = vsel %vm2563_vm7, %v2498_v11, %v645_v42  ;;  %v653_v11 = vor.u32 1.1754944e-38, %v652_v58  ;;  %vm693_vm13 = vmor %vm691_vm11, %vm692_vm8  ;;  %v710_v58 = vand.u32 2147483647, %v2533_v38 }
 0x281   :  { %v722_v28 = vmul.f32 %v718_v35, %v639_v6  ;;  %v688_v37 = vsub.f32 1.0, %v687_v2  ;;  %v684_v2 = vsel %vm681_vm10, %v683_v32, %v679_v61  ;;  %v698_v6 = vor.u32 1.1754944e-38, %v697_v41 }
 0x282   :  { %v558_v46 = vpop.f32.mrf.mxu1  ;;  %v654_v13 = vsel %vm651_vm12, %v653_v11, %v649_v20  ;;  %vm706_vm0 = vweird.f32 %v2533_v38  ;;  %vm711_vm2 = vcmp.eq.f32.partialorder %v710_v58, 8.507059e+37 }
 0x283   :  { %v2557_v63 = vadd.f32 %v722_v28, %v720_v29  ;;  %v600_v22 = vadd.f32 %v599_v24, %v558_v46  ;;  %v689_v26 = vmul.f32 %v1789_v4, %v688_v37  ;;  %v721_v28 = vmul.f32 %v684_v2, %v405_v36 }
 0x284   :  { %v712_v37 = vand.u32 2147483648, %v2533_v38 }
 0x285   :  { %734 = vst [vmem:[%s3226_s9] sm:$0xff] %v2557_v63  ;;  %v717_v31 = vmax.f32 %v600_v22, 0.0  ;;  %v690_v5 = vadd.f32 %v1789_v4, %v689_v26  ;;  %v726_v14 = vmax.f32 %v2557_v63, 0.0 }
 0x286   :  { %v1791_v16 = vpop.eup %1790  ;;  %v713_v62 = vor.u32 1.1754944e-38, %v712_v37 }
 0x287   :  { %v702_v35 = vmul.f32 %v1791_v16, %v2533_v38  ;;  %v719_v42 = vmin.f32 %v717_v31, 6.0  ;;  %v694_v24 = vsel %vm693_vm13, %v1789_v4, %v690_v5  ;;  %v728_v3 = vmin.f32 %v726_v14, 6.0  ;;  %v2600_v38 = vpop.f32.mrf.mxu3 }
 0x288   :  { %v699_v27 = vsel %vm696_vm14, %v698_v6, %v694_v24  ;;  %vm707_vm15 = vweird.f32 %v1791_v16  ;;  %v322_v31 = vadd.f32 %v2480_v59, %v2146_v51  ;;  %v325_v5 = vadd.f32 %v2484_v57, %v2155_v55 }
 0x289   :  { %v703_v29 = vsub.f32 1.0, %v702_v35  ;;  %v723_v39 = vmul.f32 %v719_v42, %v654_v13  ;;  %v730_v46 = vmul.f32 %v728_v3, %v699_v27  ;;  %vm708_vm1 = vmor %vm706_vm0, %vm707_vm15 }
 0x28b   :  { %v2581_v22 = vadd.f32 %v723_v39, %v721_v28  ;;  %v704_v34 = vmul.f32 %v1791_v16, %v703_v29  ;;  %732 = vst [vmem:[%s3227_s8] sm:$0xff] %v730_v46 }
 0x28d   :  { %735 = vst [vmem:[%s3226_s9 + $0x8] sm:$0xff] %v2581_v22  ;;  %v705_v4 = vadd.f32 %v1791_v16, %v704_v34  ;;  %v727_v61 = vmax.f32 %v2581_v22, 0.0 }
 0x28f   :  { %v709_v41 = vsel %vm708_vm1, %v1791_v16, %v705_v4  ;;  %v729_v19 = vmin.f32 %v727_v61, 6.0  ;;  %v2602_v32 = vpop.f32.mrf.mxu3 }
 0x290   :  { %v714_v26 = vsel %vm711_vm2, %v713_v62, %v709_v41 }
 0x291   :  { %v731_v20 = vmul.f32 %v729_v19, %v714_v26 }
 0x293   :  { %733 = vst [vmem:[%s3227_s8 + $0x8] sm:$0xff] %v731_v20  ;;  %752 = vmatpush.msra.mxu2 %v731_v20  ;;  %1738 = vmatpush.msrb.mxu3 %v731_v20 }
 0x295   :  { %753 = vmatpush.msra.mxu2 %v730_v46  ;;  %1739 = vmatpush.msrb.mxu3 %v730_v46 }
 0x296   :  { %1678 = vmatmul.msk.f32.vlgmr.msra.gmra.mxu2 %vm408_vm9, %v2219_v8  ;;  %1679 = vmatmul.msk.f32.vlgmr.msrb.gmra.mxu3 %vm408_vm9, %v2237_v1 }
 0x319   :  { %v755_v14 = vpop.f32.mrf.mxu2  ;;  %v758_v16 = vpop.f32.mrf.mxu3 }
 0x31a   :  { %v761_v36 = vadd.f32 %v755_v14, %v322_v31  ;;  %v762_v11 = vadd.f32 %v758_v16, %v325_v5 }
 0x31c   :  { %800 = vrot.lane.b32.xlu1 %v762_v11, %s1887_s11  ;;  %807 = vrot.lane.b32.xlu2 %v762_v11, %s1888_s12 }
 0x31d   :  { %805 = vrot.lane.b32.xlu0 %v761_v36, %s1888_s12 }
 0x324   :  { %791 = vrot.lane.b32.xlu1 %v761_v36, %s1892_s17  ;;  %798 = vrot.lane.b32.xlu2 %v761_v36, %s1887_s11 }
 0x325   :  { %793 = vrot.lane.b32.xlu0 %v762_v11, %s1892_s17 }
 0x32c   :  { %779 = vrot.lane.b32.xlu1 %v762_v11, %s1893_s20  ;;  %786 = vrot.lane.b32.xlu2 %v762_v11, %s1891_s16 }
 0x32d   :  { %784 = vrot.lane.b32.xlu0 %v761_v36, %s1891_s16 }
 0x334   :  { %772 = vrot.lane.b32.xlu1 %v762_v11, %s1895_s22  ;;  %777 = vrot.lane.b32.xlu2 %v761_v36, %s1893_s20 }
 0x335   :  { %814 = vrot.lane.b32.xlu0 %v762_v11, %s1889_s13 }
 0x33c   :  { %765 = vrot.lane.b32.xlu1 %v762_v11, %s1894_s21  ;;  %812 = vrot.lane.b32.xlu2 %v761_v36, %s1889_s13 }
 0x33d   :  { %770 = vrot.lane.b32.xlu0 %v761_v36, %s1895_s22 }
 0x344   :  { %763 = vrot.lane.b32.xlu2 %v761_v36, %s1894_s21 }
 0x376   :  { %v808_v8 = vpop.permute.xlu2 %807 }
 0x377   :  { %v811_v1 = vmul.f32 %v808_v8, %v2321_v60 }
 0x379   :  { %819 = vmatpush.msra.mxu0 %v811_v1 }
 0x37e   :  { %v799_v59 = vpop.permute.xlu2 %798 }
 0x37f   :  { %v803_v24 = vmul.f32 %v799_v59, %v2328_v0 }
 0x386   :  { %v787_v42 = vpop.permute.xlu2 %786 }
 0x387   :  { %v790_v37 = vmul.f32 %v787_v42, %v2342_v21 }
 0x38e   :  { %v801_v57 = vpop.permute.xlu1 %800  ;;  %v778_v28 = vpop.permute.xlu2 %777 }
 0x38f   :  { %v806_v2 = vpop.permute.xlu0 %805  ;;  %v804_v35 = vmul.f32 %v801_v57, %v2328_v0  ;;  %v782_v34 = vmul.f32 %v778_v28, %v2349_v23 }
 0x390   :  { %v810_v6 = vmul.f32 %v806_v2, %v2321_v60 }
 0x392   :  { %820 = vmatpush.msra.mxu0 %v810_v6 }
 0x394   :  { %821 = vmatpush.msra.mxu0 %v804_v35 }
 0x396   :  { %822 = vmatpush.msra.mxu0 %v803_v24  ;;  %v792_v13 = vpop.permute.xlu1 %791 }
 0x397   :  { %v794_v27 = vpop.permute.xlu0 %793  ;;  %v796_v29 = vmul.f32 %v792_v13, %v2335_v9 }
 0x398   :  { %v797_v3 = vmul.f32 %v794_v27, %v2335_v9  ;;  %v813_v9 = vpop.permute.xlu2 %812 }
 0x399   :  { %v817_v41 = vmul.f32 %v813_v9, %v2361_v17 }
 0x39a   :  { %823 = vmatpush.msra.mxu0 %v797_v3 }
 0x39c   :  { %824 = vmatpush.msra.mxu0 %v796_v29 }
 0x39e   :  { %825 = vmatpush.msra.mxu0 %v762_v11  ;;  %v780_v39 = vpop.permute.xlu1 %779 }
 0x39f   :  { %v785_v60 = vpop.permute.xlu0 %784  ;;  %v783_v0 = vmul.f32 %v780_v39, %v2349_v23 }
 0x3a0   :  { %826 = vmatpush.msra.mxu0 %v761_v36  ;;  %v789_v46 = vmul.f32 %v785_v60, %v2342_v21  ;;  %v764_v26 = vpop.permute.xlu2 %763 }
 0x3a1   :  { %v768_v31 = vmul.f32 %v764_v26, %v2376_v33 }
 0x3a2   :  { %827 = vmatpush.msra.mxu0 %v790_v37 }
 0x3a4   :  { %828 = vmatpush.msra.mxu0 %v789_v46 }
 0x3a6   :  { %829 = vmatpush.msra.mxu0 %v783_v0  ;;  %v773_v58 = vpop.permute.xlu1 %772 }
 0x3a7   :  { %v776_v4 = vmul.f32 %v773_v58, %v2355_v25  ;;  %v815_v61 = vpop.permute.xlu0 %814 }
 0x3a8   :  { %v818_v62 = vmul.f32 %v815_v61, %v2361_v17  ;;  %830 = vmatpush.msra.mxu0 %v782_v34 }
 0x3aa   :  { %831 = vmatpush.msra.mxu0 %v776_v4  ;;  %874 = vmatpush.msra.mxu3 %v818_v62 }
 0x3ac   :  { %875 = vmatpush.msra.mxu3 %v817_v41 }
 0x3ad   :  { %1680 = vmatmul.msk.f32.vlgmr.msra.gmra.mxu3 %vm408_vm9, %v2369_v30 }
 0x3ae   :  { %v766_v21 = vpop.permute.xlu1 %765 }
 0x3af   :  { %v771_v19 = vpop.permute.xlu0 %770  ;;  %v769_v20 = vmul.f32 %v766_v21, %v2376_v33 }
 0x3b0   :  { %v775_v23 = vmul.f32 %v771_v19, %v2355_v25 }
 0x3b2   :  { %832 = vmatpush.msra.mxu0 %v775_v23 }
 0x3b4   :  { %833 = vmatpush.msra.mxu0 %v769_v20 }
 0x3b5   :  { %1681 = vmatmul.msk.f32.gmra.mxu3 %vm408_vm9, %v2383_v43 }
 0x3b6   :  { %834 = vmatpush.msra.mxu0 %v768_v31 }
 0x3b7   :  { %835 = vmatmul.f32.vlgmr.msra.gmra.mxu0 %v2389_v15 }
 0x3bd   :  { %1682 = vmatmul.msk.f32.gmra.mxu3 %vm408_vm9, %v2397_v48 }
 0x3bf   :  { %838 = vmatmul.f32.gmra.mxu0 %v2402_v44 }
 0x3c5   :  { %1683 = vmatmul.msk.f32.gmra.mxu3 %vm408_vm9, %v2410_v45 }
 0x3c7   :  { %841 = vmatmul.f32.gmra.mxu0 %v2415_v47 }
 0x3cd   :  { %1684 = vmatmul.msk.f32.gmra.mxu3 %vm408_vm9, %v2423_v49 }
 0x3cf   :  { %844 = vmatmul.f32.gmra.mxu0 %v2428_v18 }
 0x3d5   :  { %1685 = vmatmul.msk.f32.gmra.mxu3 %vm408_vm9, %v2436_v50 }
 0x3d7   :  { %847 = vmatmul.f32.gmra.mxu0 %v2441_v7 }
 0x3dd   :  { %1686 = vmatmul.msk.f32.gmra.mxu3 %vm408_vm9, %v2449_v52 }
 0x3df   :  { %850 = vmatmul.f32.gmra.mxu0 %v2454_v12 }
 0x3e5   :  { %1687 = vmatmul.msk.f32.gmra.mxu3 %vm408_vm9, %v2462_v40 }
 0x3e7   :  { %853 = vmatmul.f32.gmra.mxu0 %v2467_v53 }
 0x3ef   :  { %856 = vmatmul.f32.gmra.mxu0 %v2475_v56 }
 0x430   :  { %v877_v25 = vpop.f32.mrf.mxu3 }
 0x434   :  { %v836_v17 = vpop.f32.mrf.mxu0 }
 0x435   :  { %v878_v30 = vadd.f32 %v877_v25, %v836_v17 }
 0x437   :  { %v1688_v43 = vmul.f32 -1.442695, %v878_v30 }
 0x438   :  { %v880_v33 = vpop.f32.mrf.mxu3 }
 0x439   :  { %1792 = vpow2.f32 %v1688_v43 }
 0x43c   :  { %v839_v15 = vpop.f32.mrf.mxu0 }
 0x43d   :  { %v881_v48 = vadd.f32 %v880_v33, %v839_v15 }
 0x43f   :  { %v1689_v45 = vmul.f32 -1.442695, %v881_v48  ;;  %v1793_v18 = vpop.eup %1792 }
 0x440   :  { %v883_v44 = vpop.f32.mrf.mxu3  ;;  %v2664_v52 = vadd.f32 1.0, %v1793_v18 }
 0x441   :  { %1794 = vpow2.f32 %v1689_v45 }
 0x442   :  { %v934_v4 = vand.u32 2147483647, %v2664_v52  ;;  %v936_v61 = vand.u32 2147483648, %v2664_v52  ;;  %vm930_vm6 = vweird.f32 %v2664_v52 }
 0x444   :  { %v842_v47 = vpop.f32.mrf.mxu0  ;;  %vm935_vm10 = vcmp.eq.f32.partialorder %v934_v4, 8.507059e+37 }
 0x445   :  { %v884_v49 = vadd.f32 %v883_v44, %v842_v47  ;;  %v937_v44 = vor.u32 1.1754944e-38, %v936_v61 }
 0x447   :  { %v1690_v50 = vmul.f32 -1.442695, %v884_v49  ;;  %v1795_v12 = vpop.eup %1794 }
 0x448   :  { %v886_v7 = vpop.f32.mrf.mxu3  ;;  %v2667_v5 = vadd.f32 1.0, %v1795_v12 }
 0x449   :  { %1796 = vpow2.f32 %v1690_v50 }
 0x44a   :  { %1798 = vrcp.f32 %v2664_v52  ;;  %vm945_vm12 = vweird.f32 %v2667_v5 }
 0x44c   :  { %v845_v40 = vpop.f32.mrf.mxu0 }
 0x44d   :  { %v887_v53 = vadd.f32 %v886_v7, %v845_v40 }
 0x44f   :  { %v1797_v56 = vpop.eup %1796  ;;  %v1691_v14 = vmul.f32 -1.442695, %v887_v53 }
 0x450   :  { %v921_v16 = vadd.f32 1.0, %v1797_v56  ;;  %v889_v36 = vpop.f32.mrf.mxu3  ;;  %v2669_v11 = vpop.eup %1798 }
 0x451   :  { %1800 = vpow2.f32 %v1691_v14  ;;  %v926_v59 = vmul.f32 %v2669_v11, %v2664_v52  ;;  %vm931_vm4 = vweird.f32 %v2669_v11 }
 0x452   :  { %1802 = vrcp.f32 %v921_v16  ;;  %v966_v23 = vand.u32 2147483648, %v921_v16  ;;  %vm960_vm5 = vweird.f32 %v921_v16  ;;  %v964_v20 = vand.u32 2147483647, %v921_v16  ;;  %vm2698_vm8 = vmor %vm930_vm6, %vm931_vm4 }
 0x453   :  { %1804 = vrcp.f32 %v2667_v5  ;;  %v927_v27 = vsub.f32 1.0, %v926_v59 }
 0x454   :  { %v848_v8 = vpop.f32.mrf.mxu0  ;;  %v967_v45 = vor.u32 1.1754944e-38, %v966_v23  ;;  %vm965_vm11 = vcmp.eq.f32.partialorder %v964_v20, 8.507059e+37 }
 0x455   :  { %v890_v1 = vadd.f32 %v889_v36, %v848_v8  ;;  %v928_v37 = vmul.f32 %v2669_v11, %v927_v27 }
 0x457   :  { %v1801_v57 = vpop.eup %1800  ;;  %v1692_v2 = vmul.f32 -1.442695, %v890_v1  ;;  %v929_v19 = vadd.f32 %v2669_v11, %v928_v37  ;;  %v949_v1 = vand.u32 2147483647, %v2667_v5 }
 0x458   :  { %v1803_v6 = vpop.eup %1802  ;;  %v2674_v35 = vadd.f32 1.0, %v1801_v57  ;;  %v892_v42 = vpop.f32.mrf.mxu3 }
 0x459   :  { %v2676_v24 = vpop.eup %1804  ;;  %v956_v13 = vmul.f32 %v1803_v6, %v921_v16  ;;  %1806 = vpow2.f32 %v1692_v2  ;;  %vm961_vm3 = vweird.f32 %v1803_v6  ;;  %v933_v48 = vsel %vm2698_vm8, %v2669_v11, %v929_v19 }
 0x45a   :  { %1808 = vrcp.f32 %v2674_v35  ;;  %v941_v28 = vmul.f32 %v2676_v24, %v2667_v5  ;;  %vm2694_vm7 = vmor %vm960_vm5, %vm961_vm3  ;;  %vm946_vm13 = vweird.f32 %v2676_v24  ;;  %v938_v40 = vsel %vm935_vm10, %v937_v44, %v933_v48 }
 0x45b   :  { %v957_v3 = vsub.f32 1.0, %v956_v13  ;;  %vm975_vm15 = vweird.f32 %v2674_v35  ;;  %v979_v16 = vand.u32 2147483647, %v2674_v35  ;;  %v981_v36 = vand.u32 2147483648, %v2674_v35  ;;  %vm2739_vm1 = vmor %vm945_vm12, %vm946_vm13 }
 0x45c   :  { %v851_v29 = vpop.f32.mrf.mxu0  ;;  %v942_v62 = vsub.f32 1.0, %v941_v28  ;;  %vm950_vm5 = vcmp.eq.f32.partialorder %v949_v1, 8.507059e+37 }
 0x45d   :  { %v893_v39 = vadd.f32 %v892_v42, %v851_v29  ;;  %v958_v60 = vmul.f32 %v1803_v6, %v957_v3  ;;  %vm980_vm3 = vcmp.eq.f32.partialorder %v979_v16, 8.507059e+37 }
 0x45e   :  { %v943_v43 = vmul.f32 %v2676_v24, %v942_v62 }
 0x45f   :  { %v1807_v46 = vpop.eup %1806  ;;  %v1693_v0 = vmul.f32 -1.442695, %v893_v39  ;;  %v959_v21 = vadd.f32 %v1803_v6, %v958_v60  ;;  %v982_v39 = vor.u32 1.1754944e-38, %v981_v36 }
 0x460   :  { %v2682_v34 = vpop.eup %1808  ;;  %v2684_v58 = vadd.f32 1.0, %v1807_v46  ;;  %v895_v9 = vpop.f32.mrf.mxu3  ;;  %v944_v56 = vadd.f32 %v2676_v24, %v943_v43 }
 0x461   :  { %v971_v41 = vmul.f32 %v2682_v34, %v2674_v35  ;;  %1810 = vpow2.f32 %v1693_v0  ;;  %v963_v33 = vsel %vm2694_vm7, %v1803_v6, %v959_v21  ;;  %vm976_vm14 = vweird.f32 %v2682_v34 }
 0x462   :  { %1812 = vrcp.f32 %v2684_v58  ;;  %v968_v7 = vsel %vm965_vm11, %v967_v45, %v963_v33  ;;  %vm2723_vm0 = vmor %vm975_vm15, %vm976_vm14  ;;  %v951_v6 = vand.u32 2147483648, %v2667_v5  ;;  %v994_v13 = vand.u32 2147483647, %v2684_v58  ;;  %v2773_v45 = vld [vmem:[%s3223_s6] sm:$0xff] }
 0x463   :  { %v972_v26 = vsub.f32 1.0, %v971_v41  ;;  %v1019_v11 = vmul.f32 %v968_v7, %v2557_v63  ;;  %v996_v35 = vand.u32 2147483648, %v2684_v58  ;;  %v948_v28 = vsel %vm2739_vm1, %v2676_v24, %v944_v56  ;;  %v2807_v56 = vld [vmem:[%s3220_s3 + $0x7] ss:$0 sm:$0xff] }
 0x464   :  { %v854_v31 = vpop.f32.mrf.mxu0  ;;  %vm990_vm4 = vweird.f32 %v2684_v58  ;;  %v952_v0 = vor.u32 1.1754944e-38, %v951_v6  ;;  %vm995_vm7 = vcmp.eq.f32.partialorder %v994_v13, 8.507059e+37  ;;  %v348_v7 = vadd.f32 %v2482_v54, %v2155_v55  ;;  %v1867_v6 = vld [vmem:[%s3220_s3 + $0x5] ss:$0 sm:$0xff] }
 0x465   :  { %v896_v17 = vadd.f32 %v895_v9, %v854_v31  ;;  %v973_v15 = vmul.f32 %v2682_v34, %v972_v26  ;;  %v997_v9 = vor.u32 1.1754944e-38, %v996_v35 }
 0x466   :  { %v953_v62 = vsel %vm950_vm5, %v952_v0, %v948_v28 }
 0x467   :  { %v1811_v47 = vpop.eup %1810  ;;  %v1015_v49 = vmax.f32 %v896_v17, 0.0  ;;  %v974_v52 = vadd.f32 %v2682_v34, %v973_v15 }
 0x468   :  { %v1813_v18 = vpop.eup %1812  ;;  %v2711_v50 = vadd.f32 1.0, %v1811_v47  ;;  %v898_v14 = vpop.f32.mrf.mxu3  ;;  %v2780_v47 = vld [vmem:[%s3223_s6 + $0x8] sm:$0xff] }
 0x469   :  { %v986_v12 = vmul.f32 %v1813_v18, %v2684_v58  ;;  %v1017_v53 = vmin.f32 %v1015_v49, 6.0  ;;  %v978_v42 = vsel %vm2723_vm0, %v2682_v34, %v974_v52  ;;  %vm991_vm2 = vweird.f32 %v1813_v18 }
 0x46a   :  { %1814 = vrcp.f32 %v2711_v50  ;;  %v983_v34 = vsel %vm980_vm3, %v982_v39, %v978_v42  ;;  %vm992_vm6 = vmor %vm990_vm4, %vm991_vm2  ;;  %v1011_v26 = vand.u32 2147483648, %v2711_v50  ;;  %v1009_v17 = vand.u32 2147483647, %v2711_v50 }
 0x46b   :  { %v1021_v8 = vmul.f32 %v1017_v53, %v938_v40  ;;  %v987_v57 = vsub.f32 1.0, %v986_v12  ;;  %v1020_v23 = vmul.f32 %v983_v34, %v2581_v22  ;;  %vm1005_vm10 = vweird.f32 %v2711_v50 }
 0x46c   :  { %v857_v2 = vpop.f32.mrf.mxu0  ;;  %v1012_v33 = vor.u32 1.1754944e-38, %v1011_v26  ;;  %vm1010_vm12 = vcmp.eq.f32.partialorder %v1009_v17, 8.507059e+37  ;;  %v345_v49 = vadd.f32 %v2478_v10, %v2146_v51  ;;  %v2856_v17 = vld [vmem:[%s3224_s7 + $0x18] sm:$0xff] }
 0x46d   :  { %v2733_v63 = vadd.f32 %v1021_v8, %v1019_v11  ;;  %v899_v27 = vadd.f32 %v898_v14, %v857_v2  ;;  %v988_v29 = vmul.f32 %v1813_v18, %v987_v57  ;;  %v1866_v8 = vld [vmem:[%s3220_s3 + $0x6] ss:$0 sm:$0xff] }
 0x46f   :  { %1696 = vst [vmem:[%s3226_s9 + $0x10] sm:$0xff] %v2733_v63  ;;  %v1016_v60 = vmax.f32 %v899_v27, 0.0  ;;  %v989_v37 = vadd.f32 %v1813_v18, %v988_v29  ;;  %v1025_v5 = vmax.f32 %v2733_v63, 0.0  ;;  %v2820_v27 = vld [vmem:[%s3220_s3 + $0x20] ss:$0 sm:$0xff] }
 0x470   :  { %v1815_v46 = vpop.eup %1814  ;;  %v2825_v29 = vld [vmem:[%s3220_s3 + $0x3] ss:$0 sm:$0xff] }
 0x471   :  { %v1001_v24 = vmul.f32 %v1815_v46, %v2711_v50  ;;  %v1018_v4 = vmin.f32 %v1016_v60, 6.0  ;;  %v993_v61 = vsel %vm992_vm6, %v1813_v18, %v989_v37  ;;  %v1027_v21 = vmin.f32 %v1025_v5, 6.0 }
 0x472   :  { %v998_v41 = vsel %vm995_vm7, %v997_v9, %v993_v61  ;;  %vm1006_vm8 = vweird.f32 %v1815_v46 }
 0x473   :  { %v1002_v19 = vsub.f32 1.0, %v1001_v24  ;;  %v1022_v58 = vmul.f32 %v1018_v4, %v953_v62  ;;  %v1029_v20 = vmul.f32 %v1027_v21, %v998_v41  ;;  %vm1007_vm11 = vmor %vm1005_vm10, %vm1006_vm8  ;;  %v1869_v24 = vld [vmem:[%s3220_s3 + $0x1] ss:$0 sm:$0xff] }
 0x475   :  { %v2755_v31 = vadd.f32 %v1022_v58, %v1020_v23  ;;  %v1003_v25 = vmul.f32 %v1815_v46, %v1002_v19  ;;  %1694 = vst [vmem:[%s3227_s8 + $0x10] sm:$0xff] %v1029_v20  ;;  %v2840_v19 = vld [vmem:[%s3224_s7 + $0x8] sm:$0xff]  ;;  %v1871_v23 = vld [vmem:[%s3220_s3] ss:$0 sm:$0xff] }
 0x477   :  { %1697 = vst [vmem:[%s3226_s9 + $0x18] sm:$0xff] %v2755_v31  ;;  %v1004_v22 = vadd.f32 %v1815_v46, %v1003_v25  ;;  %v1026_v30 = vmax.f32 %v2755_v31, 0.0  ;;  %v2850_v25 = vld [vmem:[%s3224_s7] sm:$0xff] }
 0x479   :  { %v1008_v43 = vsel %vm1007_vm11, %v1815_v46, %v1004_v22  ;;  %v1028_v15 = vmin.f32 %v1026_v30, 6.0  ;;  %v1868_v46 = vld [vmem:[%s3220_s3 + $0x2] ss:$0 sm:$0xff]  ;;  %v2863_v22 = vld [vmem:[%s3224_s7 + $0x10] sm:$0xff]  ;;  %v2869_v30 = vld [vmem:[%s3224_s7 + $0x28] sm:$0xff] }
 0x47a   :  { %v1013_v48 = vsel %vm1010_vm12, %v1012_v33, %v1008_v43  ;;  %v2876_v33 = vld [vmem:[%s3224_s7 + $0x20] sm:$0xff]  ;;  %v2882_v43 = vld [vmem:[%s3224_s7 + $0x38] sm:$0xff] }
 0x47b   :  { %v1030_v44 = vmul.f32 %v1028_v15, %v1013_v48  ;;  %v2889_v15 = vld [vmem:[%s3224_s7 + $0x30] sm:$0xff]  ;;  %v2895_v48 = vld [vmem:[%s3224_s7 + $0x48] sm:$0xff] }
 0x47d   :  { %1695 = vst [vmem:[%s3227_s8 + $0x18] sm:$0xff] %v1030_v44  ;;  %1053 = vmatpush.msrb.mxu2 %v1030_v44  ;;  %v2902_v44 = vld [vmem:[%s3224_s7 + $0x40] sm:$0xff] }
 0x47f   :  { %1054 = vmatpush.msrb.mxu2 %v1029_v20 }
 0x480   :  { %1698 = vmatmul.msk.f32.vlgmr.msrb.gmra.mxu2 %vm408_vm9, %v2773_v45 }
 0x488   :  { %1699 = vmatmul.msk.f32.gmra.mxu2 %vm408_vm9, %v2780_v47 }
 0x503   :  { %v1056_v18 = vpop.f32.mrf.mxu2 }
 0x504   :  { %v1062_v50 = vadd.f32 %v1056_v18, %v345_v49  ;;  %v2908_v49 = vld [vmem:[%s3224_s7 + $0x58] sm:$0xff]  ;;  %v2915_v18 = vld [vmem:[%s3224_s7 + $0x50] sm:$0xff] }
 0x506   :  { %1092 = vrot.lane.b32.xlu2 %v1062_v50, %s1892_s17  ;;  %1099 = vrot.lane.b32.xlu0 %v1062_v50, %s1887_s11 }
 0x507   :  { %1106 = vrot.lane.b32.xlu1 %v1062_v50, %s1888_s12 }
 0x50b   :  { %v1059_v52 = vpop.f32.mrf.mxu2 }
 0x50c   :  { %v1063_v12 = vadd.f32 %v1059_v52, %v348_v7  ;;  %v2928_v7 = vld [vmem:[%s3224_s7 + $0x60] sm:$0xff]  ;;  %v2934_v52 = vld [vmem:[%s3224_s7 + $0x78] sm:$0xff] }
 0x50e   :  { %1101 = vrot.lane.b32.xlu2 %v1063_v12, %s1887_s11  ;;  %1108 = vrot.lane.b32.xlu0 %v1063_v12, %s1888_s12 }
 0x50f   :  { %1094 = vrot.lane.b32.xlu1 %v1063_v12, %s1892_s17 }
 0x516   :  { %1080 = vrot.lane.b32.xlu2 %v1063_v12, %s1893_s20  ;;  %1078 = vrot.lane.b32.xlu0 %v1062_v50, %s1893_s20 }
 0x517   :  { %1085 = vrot.lane.b32.xlu1 %v1062_v50, %s1891_s16 }
 0x51e   :  { %1073 = vrot.lane.b32.xlu2 %v1063_v12, %s1895_s22  ;;  %1087 = vrot.lane.b32.xlu0 %v1063_v12, %s1891_s16 }
 0x51f   :  { %1115 = vrot.lane.b32.xlu1 %v1063_v12, %s1889_s13 }
 0x526   :  { %1066 = vrot.lane.b32.xlu2 %v1063_v12, %s1894_s21  ;;  %1113 = vrot.lane.b32.xlu0 %v1062_v50, %s1889_s13 }
 0x527   :  { %1071 = vrot.lane.b32.xlu1 %v1062_v50, %s1895_s22 }
 0x52e   :  { %1064 = vrot.lane.b32.xlu0 %v1062_v50, %s1894_s21 }
 0x560   :  { %v1093_v10 = vpop.permute.xlu2 %1092 }
 0x561   :  { %v1097_v35 = vmul.f32 %v1867_v6, %v1093_v10 }
 0x568   :  { %v1102_v53 = vpop.permute.xlu2 %1101 }
 0x569   :  { %v1105_v1 = vmul.f32 %v1866_v8, %v1102_v53 }
 0x570   :  { %v1081_v59 = vpop.permute.xlu2 %1080 }
 0x571   :  { %v1084_v0 = vmul.f32 %v1868_v46, %v1081_v59 }
 0x578   :  { %v1100_v54 = vpop.permute.xlu0 %1099  ;;  %v1074_v3 = vpop.permute.xlu2 %1073 }
 0x579   :  { %v1107_v40 = vpop.permute.xlu1 %1106  ;;  %v1104_v57 = vmul.f32 %v1866_v8, %v1100_v54  ;;  %v1077_v4 = vmul.f32 %v1869_v24, %v1074_v3 }
 0x57a   :  { %v1111_v11 = vmul.f32 %v2807_v56, %v1107_v40 }
 0x580   :  { %v1109_v14 = vpop.permute.xlu0 %1108  ;;  %v1067_v41 = vpop.permute.xlu2 %1066 }
 0x581   :  { %v1095_v16 = vpop.permute.xlu1 %1094  ;;  %v1112_v36 = vmul.f32 %v2807_v56, %v1109_v14  ;;  %v1070_v58 = vmul.f32 %v1871_v23, %v1067_v41 }
 0x582   :  { %v1098_v42 = vmul.f32 %v1867_v6, %v1095_v16 }
 0x583   :  { %1120 = vmatpush.msra.mxu1 %v1112_v36 }
 0x585   :  { %1121 = vmatpush.msra.mxu1 %v1111_v11 }
 0x587   :  { %1122 = vmatpush.msra.mxu1 %v1105_v1 }
 0x588   :  { %v1079_v2 = vpop.permute.xlu0 %1078 }
 0x589   :  { %v1086_v13 = vpop.permute.xlu1 %1085  ;;  %1123 = vmatpush.msra.mxu1 %v1104_v57  ;;  %v1083_v34 = vmul.f32 %v1868_v46, %v1079_v2 }
 0x58a   :  { %v1090_v5 = vmul.f32 %v2825_v29, %v1086_v13 }
 0x58b   :  { %1124 = vmatpush.msra.mxu1 %v1098_v42 }
 0x58d   :  { %1125 = vmatpush.msra.mxu1 %v1097_v35 }
 0x58f   :  { %1126 = vmatpush.msra.mxu1 %v1063_v12  ;;  %v2941_v12 = vld [vmem:[%s3224_s7 + $0x70] sm:$0xff] }
 0x590   :  { %v1088_v28 = vpop.permute.xlu0 %1087 }
 0x591   :  { %v1116_v39 = vpop.permute.xlu1 %1115  ;;  %v1091_v60 = vmul.f32 %v2825_v29, %v1088_v28  ;;  %1127 = vmatpush.msra.mxu1 %v1062_v50  ;;  %v2921_v50 = vld [vmem:[%s3224_s7 + $0x68] sm:$0xff] }
 0x592   :  { %v1119_v37 = vmul.f32 %v2820_v27, %v1116_v39 }
 0x593   :  { %1128 = vmatpush.msra.mxu1 %v1091_v60 }
 0x594   :  { %1175 = vmatpush.msra.mxu2 %v1119_v37 }
 0x595   :  { %1129 = vmatpush.msra.mxu1 %v1090_v5 }
 0x597   :  { %1130 = vmatpush.msra.mxu1 %v1084_v0 }
 0x598   :  { %v1114_v9 = vpop.permute.xlu0 %1113 }
 0x599   :  { %v1072_v61 = vpop.permute.xlu1 %1071  ;;  %v1118_v62 = vmul.f32 %v2820_v27, %v1114_v9  ;;  %1131 = vmatpush.msra.mxu1 %v1083_v34 }
 0x59a   :  { %v1076_v21 = vmul.f32 %v1869_v24, %v1072_v61 }
 0x59b   :  { %1132 = vmatpush.msra.mxu1 %v1077_v4  ;;  %1176 = vmatpush.msra.mxu2 %v1118_v62 }
 0x59c   :  { %1700 = vmatmul.msk.f32.vlgmr.msra.gmra.mxu2 %vm408_vm9, %v2840_v19 }
 0x59d   :  { %1133 = vmatpush.msra.mxu1 %v1076_v21 }
 0x59f   :  { %1134 = vmatpush.msra.mxu1 %v1070_v58 }
 0x5a0   :  { %v1065_v26 = vpop.permute.xlu0 %1064 }
 0x5a1   :  { %v1069_v20 = vmul.f32 %v1871_v23, %v1065_v26 }
 0x5a3   :  { %1135 = vmatpush.msra.mxu1 %v1069_v20 }
 0x5a4   :  { %1136 = vmatmul.f32.vlgmr.msra.gmra.mxu1 %v2850_v25  ;;  %1701 = vmatmul.msk.f32.gmra.mxu2 %vm408_vm9, %v2856_v17 }
 0x5ac   :  { %1139 = vmatmul.f32.gmra.mxu1 %v2863_v22  ;;  %1702 = vmatmul.msk.f32.gmra.mxu2 %vm408_vm9, %v2869_v30 }
 0x5b4   :  { %1142 = vmatmul.f32.gmra.mxu1 %v2876_v33  ;;  %1703 = vmatmul.msk.f32.gmra.mxu2 %vm408_vm9, %v2882_v43 }
 0x5bc   :  { %1145 = vmatmul.f32.gmra.mxu1 %v2889_v15  ;;  %1704 = vmatmul.msk.f32.gmra.mxu2 %vm408_vm9, %v2895_v48 }
 0x5c4   :  { %1148 = vmatmul.f32.gmra.mxu1 %v2902_v44  ;;  %1705 = vmatmul.msk.f32.gmra.mxu2 %vm408_vm9, %v2908_v49 }
 0x5cc   :  { %1151 = vmatmul.f32.gmra.mxu1 %v2915_v18  ;;  %1706 = vmatmul.msk.f32.gmra.mxu2 %vm408_vm9, %v2921_v50 }
 0x5d4   :  { %1154 = vmatmul.f32.gmra.mxu1 %v2928_v7  ;;  %1707 = vmatmul.msk.f32.gmra.mxu2 %vm408_vm9, %v2934_v52 }
 0x5dc   :  { %1157 = vmatmul.f32.gmra.mxu1 %v2941_v12 }
 0x61f   :  { %v1178_v10 = vpop.f32.mrf.mxu2 }
 0x621   :  { %v1137_v54 = vpop.f32.mrf.mxu1 }
 0x622   :  { %v1179_v40 = vadd.f32 %v1178_v10, %v1137_v54 }
 0x624   :  { %v1708_v14 = vmul.f32 -1.442695, %v1179_v40 }
 0x626   :  { %1816 = vpow2.f32 %v1708_v14 }
 0x627   :  { %v1181_v53 = vpop.f32.mrf.mxu2 }
 0x629   :  { %v1140_v16 = vpop.f32.mrf.mxu1 }
 0x62a   :  { %v1182_v36 = vadd.f32 %v1181_v53, %v1140_v16 }
 0x62c   :  { %v1709_v11 = vmul.f32 -1.442695, %v1182_v36  ;;  %v1817_v57 = vpop.eup %1816 }
 0x62d   :  { %v2944_v6 = vadd.f32 1.0, %v1817_v57 }
 0x62e   :  { %1818 = vpow2.f32 %v1709_v11 }
 0x62f   :  { %v1184_v8 = vpop.f32.mrf.mxu2  ;;  %vm1231_vm0 = vweird.f32 %v2944_v6 }
 0x631   :  { %v1143_v1 = vpop.f32.mrf.mxu1 }
 0x632   :  { %v1185_v59 = vadd.f32 %v1184_v8, %v1143_v1  ;;  %v1235_v8 = vand.u32 2147483647, %v2944_v6  ;;  %v1237_v1 = vand.u32 2147483648, %v2944_v6 }
 0x634   :  { %v1710_v2 = vmul.f32 -1.442695, %v1185_v59  ;;  %v1819_v13 = vpop.eup %1818  ;;  %vm1236_vm3 = vcmp.eq.f32.partialorder %v1235_v8, 8.507059e+37 }
 0x635   :  { %v2947_v39 = vadd.f32 1.0, %v1819_v13 }
 0x636   :  { %1820 = vpow2.f32 %v1710_v2 }
 0x637   :  { %v1187_v42 = vpop.f32.mrf.mxu2  ;;  %1822 = vrcp.f32 %v2944_v6  ;;  %vm1246_vm5 = vweird.f32 %v2947_v39 }
 0x639   :  { %v1146_v35 = vpop.f32.mrf.mxu1 }
 0x63a   :  { %v1188_v3 = vadd.f32 %v1187_v42, %v1146_v35 }
 0x63c   :  { %v1821_v28 = vpop.eup %1820  ;;  %v1711_v60 = vmul.f32 -1.442695, %v1188_v3 }
 0x63d   :  { %v1222_v37 = vadd.f32 1.0, %v1821_v28  ;;  %v2949_v46 = vpop.eup %1822 }
 0x63e   :  { %1824 = vpow2.f32 %v1711_v60  ;;  %v1227_v9 = vmul.f32 %v2949_v46, %v2944_v6  ;;  %vm1232_vm14 = vweird.f32 %v2949_v46 }
 0x63f   :  { %1826 = vrcp.f32 %v1222_v37  ;;  %v1190_v5 = vpop.f32.mrf.mxu2  ;;  %v1267_v35 = vand.u32 2147483648, %v1222_v37  ;;  %vm1261_vm15 = vweird.f32 %v1222_v37  ;;  %v1265_v28 = vand.u32 2147483647, %v1222_v37  ;;  %vm2978_vm2 = vmor %vm1231_vm0, %vm1232_vm14 }
 0x640   :  { %1828 = vrcp.f32 %v2947_v39  ;;  %v1228_v58 = vsub.f32 1.0, %v1227_v9 }
 0x641   :  { %v1149_v0 = vpop.f32.mrf.mxu1  ;;  %vm1266_vm4 = vcmp.eq.f32.partialorder %v1265_v28, 8.507059e+37 }
 0x642   :  { %v1191_v34 = vadd.f32 %v1190_v5, %v1149_v0  ;;  %v1229_v53 = vmul.f32 %v2949_v46, %v1228_v58 }
 0x644   :  { %v1825_v24 = vpop.eup %1824  ;;  %v1712_v4 = vmul.f32 -1.442695, %v1191_v34  ;;  %v1230_v13 = vadd.f32 %v2949_v46, %v1229_v53 }
 0x645   :  { %v1827_v61 = vpop.eup %1826  ;;  %v2954_v62 = vadd.f32 1.0, %v1825_v24 }
 0x646   :  { %v2956_v41 = vpop.eup %1828  ;;  %v1257_v21 = vmul.f32 %v1827_v61, %v1222_v37  ;;  %1830 = vpow2.f32 %v1712_v4  ;;  %vm1262_vm13 = vweird.f32 %v1827_v61  ;;  %v1234_v6 = vsel %vm2978_vm2, %v2949_v46, %v1230_v13 }
 0x647   :  { %1832 = vrcp.f32 %v2954_v62  ;;  %v1193_v23 = vpop.f32.mrf.mxu2  ;;  %v1242_v10 = vmul.f32 %v2956_v41, %v2947_v39  ;;  %vm2974_vm1 = vmor %vm1261_vm15, %vm1262_vm13  ;;  %v1238_v37 = vor.u32 1.1754944e-38, %v1237_v1  ;;  %vm1247_vm6 = vweird.f32 %v2956_v41 }
 0x648   :  { %v1258_v26 = vsub.f32 1.0, %v1257_v21  ;;  %v1268_v21 = vor.u32 1.1754944e-38, %v1267_v35  ;;  %vm1276_vm8 = vweird.f32 %v2954_v62  ;;  %v1282_v8 = vand.u32 2147483648, %v2954_v62  ;;  %vm3019_vm11 = vmor %vm1246_vm5, %vm1247_vm6 }
 0x649   :  { %v1152_v20 = vpop.f32.mrf.mxu1  ;;  %v1243_v59 = vsub.f32 1.0, %v1242_v10  ;;  %v1252_v35 = vand.u32 2147483648, %v2947_v39 }
 0x64a   :  { %v1194_v54 = vadd.f32 %v1193_v23, %v1152_v20  ;;  %v1259_v40 = vmul.f32 %v1827_v61, %v1258_v26  ;;  %v1283_v34 = vor.u32 1.1754944e-38, %v1282_v8 }
 0x64b   :  { %v1244_v24 = vmul.f32 %v2956_v41, %v1243_v59 }
 0x64c   :  { %v1831_v14 = vpop.eup %1830  ;;  %v1713_v16 = vmul.f32 -1.442695, %v1194_v54  ;;  %v1260_v2 = vadd.f32 %v1827_v61, %v1259_v40  ;;  %v1239_v54 = vsel %vm1236_vm3, %v1238_v37, %v1234_v6  ;;  %v1253_v6 = vor.u32 1.1754944e-38, %v1252_v35 }
 0x64d   :  { %v2962_v36 = vpop.eup %1832  ;;  %v2964_v11 = vadd.f32 1.0, %v1831_v14  ;;  %v1245_v53 = vadd.f32 %v2956_v41, %v1244_v24 }
 0x64e   :  { %v1272_v57 = vmul.f32 %v2962_v36, %v2954_v62  ;;  %1834 = vpow2.f32 %v1713_v16  ;;  %v1264_v9 = vsel %vm2974_vm1, %v1827_v61, %v1260_v2  ;;  %vm1277_vm7 = vweird.f32 %v2962_v36 }
 0x64f   :  { %1836 = vrcp.f32 %v2964_v11  ;;  %v1196_v42 = vpop.f32.mrf.mxu2  ;;  %v1269_v20 = vsel %vm1266_vm4, %v1268_v21, %v1264_v9  ;;  %v1280_v16 = vand.u32 2147483647, %v2954_v62  ;;  %vm3003_vm10 = vmor %vm1276_vm8, %vm1277_vm7  ;;  %v1295_v28 = vand.u32 2147483647, %v2964_v11 }
 0x650   :  { %v1273_v3 = vsub.f32 1.0, %v1272_v57  ;;  %v1320_v1 = vmul.f32 %v1269_v20, %v2733_v63  ;;  %v1250_v57 = vand.u32 2147483647, %v2947_v39  ;;  %v1297_v62 = vand.u32 2147483648, %v2964_v11 }
 0x651   :  { %v1155_v60 = vpop.f32.mrf.mxu1  ;;  %vm1281_vm13 = vcmp.eq.f32.partialorder %v1280_v16, 8.507059e+37  ;;  %vm1291_vm14 = vweird.f32 %v2964_v11  ;;  %vm1296_vm1 = vcmp.eq.f32.partialorder %v1295_v28, 8.507059e+37  ;;  %v371_v28 = vadd.f32 %v2602_v32, %v2155_v55 }
 0x652   :  { %v1197_v0 = vadd.f32 %v1196_v42, %v1155_v60  ;;  %v1274_v4 = vmul.f32 %v2962_v36, %v1273_v3  ;;  %vm1251_vm15 = vcmp.eq.f32.partialorder %v1250_v57, 8.507059e+37  ;;  %v1298_v21 = vor.u32 1.1754944e-38, %v1297_v62 }
 0x654   :  { %v1835_v23 = vpop.eup %1834  ;;  %v1316_v58 = vmax.f32 %v1197_v0, 0.0  ;;  %v1275_v10 = vadd.f32 %v2962_v36, %v1274_v4 }
 0x655   :  { %v1837_v26 = vpop.eup %1836  ;;  %v2991_v61 = vadd.f32 1.0, %v1835_v23 }
 0x656   :  { %v1287_v46 = vmul.f32 %v1837_v26, %v2964_v11  ;;  %v1318_v40 = vmin.f32 %v1316_v58, 6.0  ;;  %v1279_v3 = vsel %vm3003_vm10, %v2962_v36, %v1275_v10  ;;  %vm1292_vm12 = vweird.f32 %v1837_v26 }
 0x657   :  { %1838 = vrcp.f32 %v2991_v61  ;;  %v1199_v14 = vpop.f32.mrf.mxu2  ;;  %v1249_v36 = vsel %vm3019_vm11, %v2956_v41, %v1245_v53  ;;  %v1284_v37 = vsel %vm1281_vm13, %v1283_v34, %v1279_v3  ;;  %vm1293_vm0 = vmor %vm1291_vm14, %vm1292_vm12  ;;  %v1312_v53 = vand.u32 2147483648, %v2991_v61 }
 0x658   :  { %v1322_v59 = vmul.f32 %v1318_v40, %v1239_v54  ;;  %v1288_v42 = vsub.f32 1.0, %v1287_v46  ;;  %v1254_v20 = vsel %vm1251_vm15, %v1253_v6, %v1249_v36  ;;  %v1321_v40 = vmul.f32 %v1284_v37, %v2755_v31 }
 0x659   :  { %v1158_v13 = vpop.f32.mrf.mxu1  ;;  %vm1306_vm3 = vweird.f32 %v2991_v61 }
 0x65a   :  { %v3013_v63 = vadd.f32 %v1322_v59, %v1320_v1  ;;  %v1200_v60 = vadd.f32 %v1199_v14, %v1158_v13  ;;  %v1289_v0 = vmul.f32 %v1837_v26, %v1288_v42  ;;  %v1310_v1 = vand.u32 2147483647, %v2991_v61 }
 0x65b   :  { %v1313_v59 = vor.u32 1.1754944e-38, %v1312_v53 }
 0x65c   :  { %1716 = vst [vmem:[%s3226_s9 + $0x20] sm:$0xff] %v3013_v63  ;;  %v1317_v9 = vmax.f32 %v1200_v60, 0.0  ;;  %v1290_v24 = vadd.f32 %v1837_v26, %v1289_v0  ;;  %v1326_v39 = vmax.f32 %v3013_v63, 0.0  ;;  %vm1311_vm5 = vcmp.eq.f32.partialorder %v1310_v1, 8.507059e+37 }
 0x65d   :  { %v1839_v4 = vpop.eup %1838 }
 0x65e   :  { %v1302_v41 = vmul.f32 %v1839_v4, %v2991_v61  ;;  %v1319_v23 = vmin.f32 %v1317_v9, 6.0  ;;  %v1294_v58 = vsel %vm1293_vm0, %v1837_v26, %v1290_v24  ;;  %v1328_v46 = vmin.f32 %v1326_v39, 6.0  ;;  %v1404_v24 = vld [vmem:[%s3220_s3 + $0x6] ss:$0 sm:$0xff] }
 0x65f   :  { %v1299_v10 = vsel %vm1296_vm1, %v1298_v21, %v1294_v58  ;;  %vm1307_vm2 = vweird.f32 %v1839_v4  ;;  %v368_v61 = vadd.f32 %v2600_v38, %v2146_v51 }
 0x660   :  { %v1303_v54 = vsub.f32 1.0, %v1302_v41  ;;  %v1323_v11 = vmul.f32 %v1319_v23, %v1254_v20  ;;  %v1330_v14 = vmul.f32 %v1328_v46, %v1299_v10  ;;  %vm1308_vm4 = vmor %vm1306_vm3, %vm1307_vm2  ;;  %v1383_v10 = vld [vmem:[%s3220_s3 + $0x2] ss:$0 sm:$0xff] }
 0x662   :  { %v3035_v16 = vadd.f32 %v1323_v11, %v1321_v40  ;;  %v1304_v8 = vmul.f32 %v1839_v4, %v1303_v54  ;;  %1714 = vst [vmem:[%s3227_s8 + $0x20] sm:$0xff] %v1330_v14  ;;  %v1376_v11 = vld [vmem:[%s3220_s3 + $0x1] ss:$0 sm:$0xff] }
 0x664   :  { %1717 = vst [vmem:[%s3226_s9 + $0x28] sm:$0xff] %v3035_v16  ;;  %v1305_v31 = vadd.f32 %v1839_v4, %v1304_v8  ;;  %v1327_v26 = vmax.f32 %v3035_v16, 0.0 }
 0x666   :  { %v1309_v57 = vsel %vm1308_vm4, %v1839_v4, %v1305_v31  ;;  %v1329_v2 = vmin.f32 %v1327_v26, 6.0  ;;  %v1397_v4 = vld [vmem:[%s3220_s3 + $0x5] ss:$0 sm:$0xff] }
 0x667   :  { %v1314_v42 = vsel %vm1311_vm5, %v1313_v59, %v1309_v57 }
 0x668   :  { %v1331_v13 = vmul.f32 %v1329_v2, %v1314_v42 }
 0x66a   :  { %1715 = vst [vmem:[%s3227_s8 + $0x28] sm:$0xff] %v1331_v13  ;;  %1354 = vmatpush.msrb.mxu3 %v1331_v13 }
 0x66c   :  { %1355 = vmatpush.msrb.mxu3 %v1330_v14 }
 0x66d   :  { %1718 = vmatmul.msk.f32.vlgmr.msrb.gmra.mxu3 %vm408_vm9, %v2773_v45 }
 0x675   :  { %1719 = vmatmul.msk.f32.gmra.mxu3 %vm408_vm9, %v2780_v47 }
 0x6f0   :  { %v1357_v35 = vpop.f32.mrf.mxu3 }
 0x6f1   :  { %v1363_v3 = vadd.f32 %v1357_v35, %v368_v61 }
 0x6f3   :  { %1393 = vrot.lane.b32.xlu0 %v1363_v3, %s1892_s17  ;;  %1400 = vrot.lane.b32.xlu1 %v1363_v3, %s1887_s11 }
 0x6f4   :  { %1407 = vrot.lane.b32.xlu2 %v1363_v3, %s1888_s12 }
 0x6f8   :  { %v1360_v62 = vpop.f32.mrf.mxu3 }
 0x6f9   :  { %v1364_v60 = vadd.f32 %v1360_v62, %v371_v28 }
 0x6fb   :  { %1402 = vrot.lane.b32.xlu0 %v1364_v60, %s1887_s11  ;;  %1409 = vrot.lane.b32.xlu1 %v1364_v60, %s1888_s12 }
 0x6fc   :  { %1395 = vrot.lane.b32.xlu2 %v1364_v60, %s1892_s17 }
 0x703   :  { %1381 = vrot.lane.b32.xlu0 %v1364_v60, %s1893_s20  ;;  %1379 = vrot.lane.b32.xlu1 %v1363_v3, %s1893_s20 }
 0x704   :  { %1386 = vrot.lane.b32.xlu2 %v1363_v3, %s1891_s16 }
 0x70b   :  { %1374 = vrot.lane.b32.xlu0 %v1364_v60, %s1895_s22  ;;  %1388 = vrot.lane.b32.xlu1 %v1364_v60, %s1891_s16 }
 0x70c   :  { %1416 = vrot.lane.b32.xlu2 %v1364_v60, %s1889_s13 }
 0x713   :  { %1367 = vrot.lane.b32.xlu0 %v1364_v60, %s1894_s21  ;;  %1414 = vrot.lane.b32.xlu1 %v1363_v3, %s1889_s13 }
 0x714   :  { %1372 = vrot.lane.b32.xlu2 %v1363_v3, %s1895_s22 }
 0x71b   :  { %1365 = vrot.lane.b32.xlu1 %v1363_v3, %s1894_s21 }
 0x74e   :  { %v1408_v51 = vpop.permute.xlu2 %1407 }
 0x74f   :  { %v1412_v9 = vmul.f32 %v1408_v51, %v2807_v56 }
 0x756   :  { %v1396_v55 = vpop.permute.xlu2 %1395 }
 0x757   :  { %v1399_v41 = vmul.f32 %v1397_v4, %v1396_v55 }
 0x75e   :  { %v1387_v38 = vpop.permute.xlu2 %1386 }
 0x75f   :  { %v1391_v46 = vmul.f32 %v1387_v38, %v2825_v29 }
 0x765   :  { %v1394_v32 = vpop.permute.xlu0 %1393  ;;  %v1401_v45 = vpop.permute.xlu1 %1400 }
 0x766   :  { %v1417_v47 = vpop.permute.xlu2 %1416  ;;  %v1405_v6 = vmul.f32 %v1404_v24, %v1401_v45 }
 0x767   :  { %v1420_v5 = vmul.f32 %v1417_v47, %v2820_v27 }
 0x769   :  { %1476 = vmatpush.msra.mxu3 %v1420_v5 }
 0x76d   :  { %v1403_v0 = vpop.permute.xlu0 %1402  ;;  %v1410_v36 = vpop.permute.xlu1 %1409 }
 0x76e   :  { %v1413_v34 = vmul.f32 %v1410_v36, %v2807_v56  ;;  %v1406_v39 = vmul.f32 %v1404_v24, %v1403_v0  ;;  %v1398_v56 = vmul.f32 %v1397_v4, %v1394_v32  ;;  %v1373_v53 = vpop.permute.xlu2 %1372 }
 0x76f   :  { %v1377_v26 = vmul.f32 %v1376_v11, %v1373_v53 }
 0x770   :  { %1421 = vmatpush.msrb.mxu0 %v1413_v34  ;;  %1740 = vmatpush.msrb.mxu1 %v1413_v34 }
 0x772   :  { %1422 = vmatpush.msrb.mxu0 %v1412_v9  ;;  %1741 = vmatpush.msrb.mxu1 %v1412_v9 }
 0x774   :  { %1423 = vmatpush.msrb.mxu0 %v1406_v39  ;;  %1742 = vmatpush.msrb.mxu1 %v1406_v39 }
 0x775   :  { %v1382_v37 = vpop.permute.xlu0 %1381  ;;  %v1380_v21 = vpop.permute.xlu1 %1379 }
 0x776   :  { %1424 = vmatpush.msrb.mxu0 %v1405_v6  ;;  %1743 = vmatpush.msrb.mxu1 %v1405_v6  ;;  %v1385_v54 = vmul.f32 %v1383_v10, %v1382_v37  ;;  %v1384_v40 = vmul.f32 %v1383_v10, %v1380_v21 }
 0x778   :  { %1425 = vmatpush.msrb.mxu0 %v1399_v41  ;;  %1744 = vmatpush.msrb.mxu1 %v1399_v41 }
 0x77a   :  { %1426 = vmatpush.msrb.mxu0 %v1398_v56  ;;  %1745 = vmatpush.msrb.mxu1 %v1398_v56 }
 0x77c   :  { %1427 = vmatpush.msrb.mxu0 %v1364_v60  ;;  %1746 = vmatpush.msrb.mxu1 %v1364_v60 }
 0x77d   :  { %v1375_v23 = vpop.permute.xlu0 %1374  ;;  %v1389_v58 = vpop.permute.xlu1 %1388 }
 0x77e   :  { %v1392_v20 = vmul.f32 %v1389_v58, %v2825_v29  ;;  %1428 = vmatpush.msrb.mxu0 %v1363_v3  ;;  %1747 = vmatpush.msrb.mxu1 %v1363_v3  ;;  %v1378_v8 = vmul.f32 %v1376_v11, %v1375_v23  ;;  %v1369_v29 = vld [vmem:[%s3220_s3] ss:$0 sm:$0xff] }
 0x780   :  { %1429 = vmatpush.msrb.mxu0 %v1392_v20  ;;  %1748 = vmatpush.msrb.mxu1 %v1392_v20 }
 0x782   :  { %1430 = vmatpush.msrb.mxu0 %v1391_v46  ;;  %1749 = vmatpush.msrb.mxu1 %v1391_v46 }
 0x784   :  { %1431 = vmatpush.msrb.mxu0 %v1385_v54  ;;  %1750 = vmatpush.msrb.mxu1 %v1385_v54 }
 0x785   :  { %v1415_v14 = vpop.permute.xlu1 %1414  ;;  %v1368_v31 = vpop.permute.xlu0 %1367 }
 0x786   :  { %v1419_v1 = vmul.f32 %v1415_v14, %v2820_v27  ;;  %1432 = vmatpush.msrb.mxu0 %v1384_v40  ;;  %1751 = vmatpush.msrb.mxu1 %v1384_v40  ;;  %v1371_v59 = vmul.f32 %v1369_v29, %v1368_v31 }
 0x788   :  { %1433 = vmatpush.msrb.mxu0 %v1378_v8  ;;  %1752 = vmatpush.msrb.mxu1 %v1378_v8 }
 0x789   :  { %1477 = vmatpush.msra.mxu3 %v1419_v1 }
 0x78a   :  { %1720 = vmatmul.msk.f32.vlgmr.msra.gmra.mxu3 %vm408_vm9, %v2840_v19  ;;  %1434 = vmatpush.msrb.mxu0 %v1377_v26 }
 0x78b   :  { %1753 = vmatpush.msrb.mxu1 %v1377_v26 }
 0x78c   :  { %1435 = vmatpush.msrb.mxu0 %v1371_v59 }
 0x78d   :  { %1754 = vmatpush.msrb.mxu1 %v1371_v59  ;;  %v1366_v27 = vpop.permute.xlu1 %1365 }
 0x78e   :  { %v1370_v57 = vmul.f32 %v1369_v29, %v1366_v27 }
 0x790   :  { %1436 = vmatpush.msrb.mxu0 %v1370_v57  ;;  %1755 = vmatpush.msrb.mxu1 %v1370_v57 }
 0x791   :  { %1437 = vmatmul.f32.vlgmr.msrb.gmra.mxu0 %v2850_v25  ;;  %1458 = vmatmul.f32.vlgmr.msrb.gmra.mxu1 %v2941_v12 }
 0x792   :  { %1721 = vmatmul.msk.f32.gmra.mxu3 %vm408_vm9, %v2856_v17 }
 0x799   :  { %1440 = vmatmul.f32.gmra.mxu0 %v2863_v22 }
 0x79a   :  { %1722 = vmatmul.msk.f32.gmra.mxu3 %vm408_vm9, %v2869_v30 }
 0x7a1   :  { %1443 = vmatmul.f32.gmra.mxu0 %v2876_v33 }
 0x7a2   :  { %1723 = vmatmul.msk.f32.gmra.mxu3 %vm408_vm9, %v2882_v43 }
 0x7a9   :  { %1446 = vmatmul.f32.gmra.mxu0 %v2889_v15 }
 0x7aa   :  { %1724 = vmatmul.msk.f32.gmra.mxu3 %vm408_vm9, %v2895_v48 }
 0x7b1   :  { %1449 = vmatmul.f32.gmra.mxu0 %v2902_v44 }
 0x7b2   :  { %1725 = vmatmul.msk.f32.gmra.mxu3 %vm408_vm9, %v2908_v49 }
 0x7b9   :  { %1452 = vmatmul.f32.gmra.mxu0 %v2915_v18 }
 0x7ba   :  { %1726 = vmatmul.msk.f32.gmra.mxu3 %vm408_vm9, %v2921_v50 }
 0x7c1   :  { %1455 = vmatmul.f32.gmra.mxu0 %v2928_v7 }
 0x7c2   :  { %1727 = vmatmul.msk.f32.gmra.mxu3 %vm408_vm9, %v2934_v52 }
 0x80d   :  { %v1479_v19 = vpop.f32.mrf.mxu3 }
 0x80e   :  { %v1438_v25 = vpop.f32.mrf.mxu0 }
 0x80f   :  { %v1480_v17 = vadd.f32 %v1479_v19, %v1438_v25 }
 0x811   :  { %v1728_v30 = vmul.f32 -1.442695, %v1480_v17 }
 0x813   :  { %1840 = vpow2.f32 %v1728_v30 }
 0x815   :  { %v1482_v22 = vpop.f32.mrf.mxu3 }
 0x816   :  { %v1441_v33 = vpop.f32.mrf.mxu0 }
 0x817   :  { %v1483_v43 = vadd.f32 %v1482_v22, %v1441_v33 }
 0x819   :  { %v1729_v15 = vmul.f32 -1.442695, %v1483_v43  ;;  %v1841_v18 = vpop.eup %1840 }
 0x81a   :  { %v1521_v7 = vadd.f32 1.0, %v1841_v18 }
 0x81b   :  { %1842 = vpow2.f32 %v1729_v15 }
 0x81c   :  { %v1536_v20 = vand.u32 2147483647, %v1521_v7  ;;  %v1538_v10 = vand.u32 2147483648, %v1521_v7  ;;  %vm1532_vm8 = vweird.f32 %v1521_v7 }
 0x81d   :  { %v1485_v48 = vpop.f32.mrf.mxu3 }
 0x81e   :  { %v1444_v44 = vpop.f32.mrf.mxu0  ;;  %vm3143_vm10 = vcmp.eq.f32.partialorder %v1536_v20, 8.507059e+37  ;;  %v1539_v57 = vor.u32 1.1754944e-38, %v1538_v10 }
 0x81f   :  { %v1486_v49 = vadd.f32 %v1485_v48, %v1444_v44 }
 0x821   :  { %v1730_v50 = vmul.f32 -1.442695, %v1486_v49  ;;  %v1843_v12 = vpop.eup %1842 }
 0x822   :  { %v3119_v52 = vadd.f32 1.0, %v1843_v12 }
 0x823   :  { %1844 = vpow2.f32 %v1730_v50 }
 0x824   :  { %1846 = vrcp.f32 %v1521_v7  ;;  %vm1547_vm13 = vweird.f32 %v3119_v52 }
 0x825   :  { %v1488_v2 = vpop.f32.mrf.mxu3  ;;  %1848 = vrcp.f32 %v3119_v52 }
 0x826   :  { %v1447_v42 = vpop.f32.mrf.mxu0 }
 0x827   :  { %v1489_v13 = vadd.f32 %v1488_v2, %v1447_v42  ;;  %v1551_v2 = vand.u32 2147483647, %v3119_v52  ;;  %v1553_v42 = vand.u32 2147483648, %v3119_v52 }
 0x829   :  { %v1845_v61 = vpop.eup %1844  ;;  %v1731_v35 = vmul.f32 -1.442695, %v1489_v13  ;;  %vm1552_vm5 = vcmp.eq.f32.partialorder %v1551_v2, 8.507059e+37 }
 0x82a   :  { %v1523_v3 = vadd.f32 1.0, %v1845_v61  ;;  %v3122_v28 = vpop.eup %1846 }
 0x82b   :  { %1850 = vpow2.f32 %v1731_v35  ;;  %v3124_v55 = vpop.eup %1848  ;;  %v1528_v38 = vmul.f32 %v3122_v28, %v1521_v7  ;;  %vm1533_vm6 = vweird.f32 %v3122_v28  ;;  %v1459_v7 = vpop.f32.mrf.mxu1 }
 0x82c   :  { %1852 = vrcp.f32 %v1523_v3  ;;  %v1543_v24 = vmul.f32 %v3124_v55, %v3119_v52  ;;  %v1568_v11 = vand.u32 2147483648, %v1523_v3  ;;  %vm1562_vm7 = vweird.f32 %v1523_v3  ;;  %vm3151_vm12 = vmor %vm1532_vm8, %vm1533_vm6 }
 0x82d   :  { %v1491_v62 = vpop.f32.mrf.mxu3  ;;  %v1529_v36 = vsub.f32 1.0, %v1528_v38  ;;  %v1566_v8 = vand.u32 2147483647, %v1523_v3  ;;  %vm1548_vm14 = vweird.f32 %v3124_v55 }
 0x82e   :  { %v1450_v60 = vpop.f32.mrf.mxu0  ;;  %v1544_v56 = vsub.f32 1.0, %v1543_v24  ;;  %v1569_v22 = vor.u32 1.1754944e-38, %v1568_v11  ;;  %vm3179_vm1 = vmor %vm1547_vm13, %vm1548_vm14 }
 0x82f   :  { %v1492_v51 = vadd.f32 %v1491_v62, %v1450_v60  ;;  %v1530_v37 = vmul.f32 %v3122_v28, %v1529_v36  ;;  %vm1567_vm15 = vcmp.eq.f32.partialorder %v1566_v8, 8.507059e+37 }
 0x830   :  { %v1545_v1 = vmul.f32 %v3124_v55, %v1544_v56 }
 0x831   :  { %v1851_v32 = vpop.eup %1850  ;;  %v1732_v45 = vmul.f32 -1.442695, %v1492_v51  ;;  %v1531_v40 = vadd.f32 %v3122_v28, %v1530_v37 }
 0x832   :  { %v1853_v47 = vpop.eup %1852  ;;  %v3127_v5 = vadd.f32 1.0, %v1851_v32  ;;  %v1546_v43 = vadd.f32 %v3124_v55, %v1545_v1 }
 0x833   :  { %v1558_v0 = vmul.f32 %v1853_v47, %v1523_v3  ;;  %1854 = vpow2.f32 %v1732_v45  ;;  %vm1563_vm9 = vweird.f32 %v1853_v47  ;;  %v1535_v17 = vsel %vm3151_vm12, %v3122_v28, %v1531_v40 }
 0x834   :  { %1856 = vrcp.f32 %v3127_v5  ;;  %vm3147_vm11 = vmor %vm1562_vm7, %vm1563_vm9  ;;  %v1583_v15 = vand.u32 2147483648, %v3127_v5  ;;  %v1540_v13 = vsel %vm3143_vm10, %v1539_v57, %v1535_v17  ;;  %vm1577_vm2 = vweird.f32 %v3127_v5 }
 0x835   :  { %v1559_v34 = vsub.f32 1.0, %v1558_v0  ;;  %v1494_v9 = vpop.f32.mrf.mxu3  ;;  %v1581_v35 = vand.u32 2147483647, %v3127_v5  ;;  %v1550_v51 = vsel %vm3179_vm1, %v3124_v55, %v1546_v43  ;;  %v1554_v55 = vor.u32 1.1754944e-38, %v1553_v42 }
 0x836   :  { %v1453_v39 = vpop.f32.mrf.mxu0 }
 0x837   :  { %v1495_v4 = vadd.f32 %v1494_v9, %v1453_v39  ;;  %v1560_v6 = vmul.f32 %v1853_v47, %v1559_v34  ;;  %vm1582_vm9 = vcmp.eq.f32.partialorder %v1581_v35, 8.507059e+37 }
 0x839   :  { %v1855_v21 = vpop.eup %1854  ;;  %v1733_v41 = vmul.f32 -1.442695, %v1495_v4  ;;  %v1561_v54 = vadd.f32 %v1853_v47, %v1560_v6  ;;  %v1555_v6 = vsel %vm1552_vm5, %v1554_v55, %v1550_v51 }
 0x83a   :  { %v3133_v23 = vpop.eup %1856  ;;  %v3135_v58 = vadd.f32 1.0, %v1855_v21 }
 0x83b   :  { %v1573_v46 = vmul.f32 %v3133_v23, %v3127_v5  ;;  %1858 = vpow2.f32 %v1733_v41  ;;  %v1565_v19 = vsel %vm3147_vm11, %v1853_v47, %v1561_v54  ;;  %vm1578_vm0 = vweird.f32 %v3133_v23 }
 0x83c   :  { %1860 = vrcp.f32 %v3135_v58  ;;  %v1570_v49 = vsel %vm1567_vm15, %v1569_v22, %v1565_v19  ;;  %vm3191_vm3 = vmor %vm1577_vm2, %vm1578_vm0  ;;  %v1598_v38 = vand.u32 2147483648, %v3135_v58  ;;  %v1596_v5 = vand.u32 2147483647, %v3135_v58 }
 0x83d   :  { %v1574_v53 = vsub.f32 1.0, %v1573_v46  ;;  %v1497_v14 = vpop.f32.mrf.mxu3  ;;  %v1621_v28 = vmul.f32 %v1570_v49, %v3013_v63  ;;  %v1584_v63 = vor.u32 1.1754944e-38, %v1583_v15  ;;  %vm1592_vm6 = vweird.f32 %v3135_v58 }
 0x83e   :  { %v1456_v29 = vpop.f32.mrf.mxu0  ;;  %v1599_v4 = vor.u32 1.1754944e-38, %v1598_v38  ;;  %vm1597_vm8 = vcmp.eq.f32.partialorder %v1596_v5, 8.507059e+37 }
 0x83f   :  { %v1498_v59 = vadd.f32 %v1497_v14, %v1456_v29  ;;  %v1575_v25 = vmul.f32 %v3133_v23, %v1574_v53 }
 0x841   :  { %v1859_v30 = vpop.eup %1858  ;;  %v1617_v33 = vmax.f32 %v1498_v59, 0.0  ;;  %v1576_v18 = vadd.f32 %v3133_v23, %v1575_v25 }
 0x842   :  { %v1861_v48 = vpop.eup %1860  ;;  %v3165_v44 = vadd.f32 1.0, %v1859_v30 }
 0x843   :  { %v1588_v50 = vmul.f32 %v1861_v48, %v3135_v58  ;;  %v1619_v12 = vmin.f32 %v1617_v33, 6.0  ;;  %v1580_v45 = vsel %vm3191_vm3, %v3133_v23, %v1576_v18  ;;  %vm1593_vm4 = vweird.f32 %v1861_v48 }
 0x844   :  { %1862 = vrcp.f32 %v3165_v44  ;;  %v1585_v24 = vsel %vm1582_vm9, %v1584_v63, %v1580_v45  ;;  %vm1594_vm7 = vmor %vm1592_vm6, %vm1593_vm4  ;;  %v1613_v54 = vand.u32 2147483648, %v3165_v44  ;;  %v1611_v53 = vand.u32 2147483647, %v3165_v44 }
 0x845   :  { %v1589_v3 = vsub.f32 1.0, %v1588_v50  ;;  %v1623_v62 = vmul.f32 %v1619_v12, %v1540_v13  ;;  %v1500_v60 = vpop.f32.mrf.mxu3  ;;  %v1622_v58 = vmul.f32 %v1585_v24, %v3035_v16  ;;  %vm1607_vm11 = vweird.f32 %v3165_v44 }
 0x846   :  { %v1501_v32 = vadd.f32 %v1500_v60, %v1459_v7  ;;  %v1614_v8 = vor.u32 1.1754944e-38, %v1613_v54  ;;  %vm1612_vm13 = vcmp.eq.f32.partialorder %v1611_v53, 8.507059e+37 }
 0x847   :  { %v1590_v47 = vmul.f32 %v1861_v48, %v1589_v3  ;;  %v1625_v0 = vadd.f32 %v1623_v62, %v1621_v28 }
 0x848   :  { %v1618_v36 = vmax.f32 %v1501_v32, 0.0 }
 0x849   :  { %v1591_v34 = vadd.f32 %v1861_v48, %v1590_v47  ;;  %v1627_v9 = vmax.f32 %v1625_v0, 0.0  ;;  %1736 = vst [vmem:[%s3226_s9 + $0x30] sm:$0xff] %v1625_v0 }
 0x84a   :  { %v1863_v39 = vpop.eup %1862  ;;  %v1620_v37 = vmin.f32 %v1618_v36, 6.0 }
 0x84b   :  { %v1603_v21 = vmul.f32 %v1863_v39, %v3165_v44  ;;  %v1595_v41 = vsel %vm1594_vm7, %v1861_v48, %v1591_v34  ;;  %v1629_v56 = vmin.f32 %v1627_v9, 6.0  ;;  %vm1608_vm10 = vweird.f32 %v1863_v39 }
 0x84c   :  { %v1600_v23 = vsel %vm1597_vm8, %v1599_v4, %v1595_v41  ;;  %v1624_v20 = vmul.f32 %v1620_v37, %v1555_v6  ;;  %vm1609_vm12 = vmor %vm1607_vm11, %vm1608_vm10 }
 0x84d   :  { %v1604_v10 = vsub.f32 1.0, %v1603_v21  ;;  %v1631_v46 = vmul.f32 %v1629_v56, %v1600_v23 }
 0x84e   :  { %v1626_v40 = vadd.f32 %v1624_v20, %v1622_v58 }
 0x84f   :  { %v1605_v11 = vmul.f32 %v1863_v39, %v1604_v10  ;;  %1734 = vst [vmem:[%s3227_s8 + $0x30] sm:$0xff] %v1631_v46 }
 0x850   :  { %v1628_v14 = vmax.f32 %v1626_v40, 0.0  ;;  %1737 = vst [vmem:[%s3226_s9 + $0x38] sm:$0xff] %v1626_v40 }
 0x851   :  { %v1606_v16 = vadd.f32 %v1863_v39, %v1605_v11 }
 0x852   :  { %v1630_v29 = vmin.f32 %v1628_v14, 6.0 }
 0x853   :  { %v1610_v1 = vsel %vm1609_vm12, %v1863_v39, %v1606_v16 }
 0x854   :  { %v1615_v31 = vsel %vm1612_vm13, %v1614_v8, %v1610_v1 }
 0x855   :  { %v1632_v26 = vmul.f32 %v1630_v29, %v1615_v31 }
 0x857   :  { %1735 = vst [vmem:[%s3227_s8 + $0x38] sm:$0xff] %v1632_v26 }

</bundles_post_ra>
